<compile_context>
chip_gen: v7x
topology: tpu7x:2x2x1
jax: 0.10.0
libtpu: 0.0.40
codegen_flags: <defaults>
</compile_context>

<pallas_src>
import math
from functools import partial

import jax
import jax.numpy as jnp
from jax import lax
from jax.experimental import pallas as pl
from jax.experimental.pallas import tpu as pltpu

MXU_DTYPE = jnp.float32    # f32 operands: free numerics win in this regime
ACC_DTYPE = jnp.float32
CHUNK_SIZE = 256           # SSD default; single-chunk quadratic form exact for L <= 256


def _mxu_dot(a, b):
    return jnp.dot(a.astype(MXU_DTYPE), b.astype(MXU_DTYPE),
                   preferred_element_type=ACC_DTYPE)


def _layernorm(x, g, b, eps=1e-5):   # torch LayerNorm default eps
    mu = jnp.mean(x, axis=-1, keepdims=True)
    xc = x - mu
    var = jnp.mean(xc * xc, axis=-1, keepdims=True)
    return xc * lax.rsqrt(var + eps) * g + b


def _gelu(x):
    # exact-erf GELU; erf via Abramowitz&Stegun 7.1.26 (max err ~1.5e-7, fp32)
    z = x * jnp.float32(0.7071067811865476)
    p = jnp.float32(0.3275911)
    a1 = jnp.float32(0.254829592); a2 = jnp.float32(-0.284496736)
    a3 = jnp.float32(1.421413741); a4 = jnp.float32(-1.453152027)
    a5 = jnp.float32(1.061405429)
    az = jnp.abs(z)
    t = 1.0 / (1.0 + p * az)
    poly = ((((a5 * t + a4) * t + a3) * t + a2) * t + a1) * t
    erf_abs = 1.0 - poly * jnp.exp(-az * az)
    erf = jnp.where(z >= 0, erf_abs, -erf_abs)
    return 0.5 * x * (1.0 + erf)


def _make_fused_kernel(cfg, dims):
    """One kernel = encoder + all MambaBlocks + pooling + decoder + softmax."""
    L, BB, H = dims['L'], dims['BB'], dims['H']
    d_inner, d_state = dims['d_inner'], dims['d_state']
    nheads, headdim = dims['nheads'], dims['headdim']
    num_layers = cfg['num_layers']
    prenorm, glu, pooling = cfg['prenorm'], cfg['glu'], cfg['pooling']
    rows = BB * L

    def kernel(*refs):
        it = iter(refs)
        x_ref = next(it)
        enc_w, enc_b = next(it), next(it)
        ln_g, ln_b = next(it), next(it)
        w_in = next(it)                      # (num_layers, H, padk)
        w_out = next(it)                     # (num_layers, d_inner, H)
        if glu:
            glu_w, glu_b = next(it), next(it)
        dec_w, dec_b = next(it), next(it)
        scal = next(it)                      # SMEM (num_layers, 3*nheads + 1)
        o_ref = next(it)                     # (BB, Dout)

        # fused linear_encoder
        h = _mxu_dot(x_ref[...].astype(jnp.float32), enc_w[...]) + enc_b[...]

        # block-diagonal causal mask over the (BB sequences x L steps) row slab
        # (division-free: per-sequence range test, hoisted out of the layer loop)
        t_idx = lax.broadcasted_iota(jnp.int32, (rows, rows), 0)
        s_idx = lax.broadcasted_iota(jnp.int32, (rows, rows), 1)
        causal = s_idx <= t_idx
        if BB > 1:
            same = None
            for b in range(BB):
                tb = (t_idx >= b * L) & (t_idx < (b + 1) * L)
                sb = (s_idx >= b * L) & (s_idx < (b + 1) * L)
                blk = tb & sb
                same = blk if same is None else (same | blk)
            causal = causal & same
        tril = causal.astype(jnp.float32)

        for layer in range(num_layers):
            lam = scal[layer, 3 * nheads]                     # lambd (SMEM scalar)
            skip = lam * h
            xn = _layernorm(h, ln_g[layer], ln_b[layer]) if prenorm else h

            # single merged in_proj matmul; static lane slices x | B | C | dt
            xbcdt = _mxu_dot(xn, w_in[layer])                 # (rows, padk)
            xpart = xbcdt[:, :d_inner]
            bmat = xbcdt[:, d_inner:d_inner + d_state]
            cmat = xbcdt[:, d_inner + d_state:d_inner + 2 * d_state]
            dt_raw = xbcdt[:, d_inner + 2 * d_state:d_inner + 2 * d_state + nheads]

            # CB[t, s] = sum_n C[t, n] * B[s, n]
            CB = lax.dot_general(cmat, bmat, (((1,), (1,)), ((), ())),
                                 preferred_element_type=ACC_DTYPE)

            if nheads == 1:
                dt_bias = scal[layer, 0]
                negA = scal[layer, nheads]                    # = -exp(A_log)
                dsc = scal[layer, 2 * nheads]
                z = dt_raw + dt_bias                          # (rows, 1)
                dt = jnp.maximum(z, 0.0) + jnp.log(1.0 + jnp.exp(-jnp.abs(z)))
                dtA = dt * negA
                # inclusive per-sequence cumsum via masked lane reduce (VPU/XLU)
                cA = jnp.sum(tril * jnp.transpose(dtA), axis=1, keepdims=True)
                diff = cA - jnp.transpose(cA)                 # cA[t] - cA[s]
                decay = jnp.exp(jnp.where(causal, diff, 0.0)) * tril
                M = CB * decay * jnp.transpose(dt)            # dt applied at source s
                y = _mxu_dot(M, xpart) + dsc * xpart
            else:
                # fallback for expansion > 1 (unexercised in the given config)
                ys = []
                for hh in range(nheads):
                    dt_bias = scal[layer, hh]
                    negA = scal[layer, nheads + hh]
                    dsc = scal[layer, 2 * nheads + hh]
                    z = dt_raw[:, hh:hh + 1] + dt_bias
                    dt = jnp.maximum(z, 0.0) + jnp.log(1.0 + jnp.exp(-jnp.abs(z)))
                    dtA = dt * negA
                    cA = jnp.sum(tril * jnp.transpose(dtA), axis=1, keepdims=True)
                    diff = cA - jnp.transpose(cA)
                    decay = jnp.exp(jnp.where(causal, diff, 0.0)) * tril
                    M = CB * decay * jnp.transpose(dt)
                    xh = xpart[:, hh * headdim:(hh + 1) * headdim]
                    ys.append(_mxu_dot(M, xh) + dsc * xh)
                y = jnp.concatenate(ys, axis=-1)

            hid = _mxu_dot(y, w_out[layer])                   # out_proj (bias=False)
            g = _gelu(hid)                                    # dropout(p=0) == id
            if glu:
                gl = _mxu_dot(g, glu_w[layer]) + glu_b[layer]  # (rows, 2H), one matmul
                val = gl[:, :H]
                gate = gl[:, H:2 * H]
                g = val * (1.0 / (1.0 + jnp.exp(-gate)))
            h = g + skip
            if not prenorm:
                h = _layernorm(h, ln_g[layer], ln_b[layer])

        # head: per-sequence pooling + linear_decoder + softmax (all in-kernel)
        hb = h.reshape(BB, L, H)
        if pooling == 'mean':
            pooled = jnp.sum(hb, axis=1) * (1.0 / L)
        elif pooling == 'max':
            pooled = jnp.max(hb, axis=1)
        elif pooling == 'last':
            pooled = hb[:, L - 1, :]
        else:
            raise NotImplementedError("only mean/max/last pooling implemented")
        logits = _mxu_dot(pooled, dec_w[...]) + dec_b[...]
        m = jnp.max(logits, axis=-1, keepdims=True)           # torch.softmax(dim=1)
        e = jnp.exp(logits - m)
        o_ref[...] = (e / jnp.sum(e, axis=-1, keepdims=True)).astype(o_ref.dtype)

    return kernel


def _const_spec(arr):
    nd = arr.ndim
    return pl.BlockSpec(arr.shape, lambda b, _nd=nd: (0,) * _nd)


def _choose_block_batch(B, L, row_cap=128, min_steps=2):
    """Largest divisor of B with BB*L <= row_cap, keeping >=2 grid steps when
    B >= 2 so both v7x TensorCores get a 'parallel' step."""
    best = 1
    for bb in range(1, B + 1):
        if B % bb:
            continue
        if bb * L > row_cap:
            continue
        if B // bb < min(min_steps, B):
            continue
        best = bb
    return best


def mamba_forward(params, x, cfg, block_batch=None):
    B, L, Din = x.shape
    H = cfg['hidden_dim']
    d_state = cfg['state_dim']
    d_inner = cfg['expansion'] * H
    headdim = H                              # MambaBlock passes headdim=hidden_dim
    nheads = d_inner // headdim
    Dout = cfg['output_dim']
    assert L <= CHUNK_SIZE, "single-chunk SSD form requires seqlen <= chunk_size"

    bb = _choose_block_batch(B, L) if block_batch is None else block_batch
    assert B % bb == 0
    rows = bb * L
    nsteps = B // bb

    dims = dict(L=L, BB=bb, H=H, d_inner=d_inner, d_state=d_state,
                nheads=nheads, headdim=headdim)
    kernel = _make_fused_kernel(cfg, dims)

    # sequences laid out contiguously along the sublane (row) axis
    x2 = x.reshape(B * L, Din)

    weights = [params['enc_w'], params['enc_b'],
               params['ln_g'], params['ln_b'],
               params['w_in'], params['w_out']]
    if cfg['glu']:
        weights += [params['glu_w'], params['glu_b']]
    weights += [params['dec_w'], params['dec_b']]

    in_specs = [pl.BlockSpec((rows, Din), lambda b: (b, 0))]
    in_specs += [_const_spec(w) for w in weights]
    in_specs += [pl.BlockSpec(memory_space=pltpu.MemorySpace.SMEM)]   # scalars

    out3 = pl.pallas_call(
        kernel,
        out_shape=jax.ShapeDtypeStruct((nsteps, bb, Dout), jnp.float32),
        grid=(nsteps,),
        in_specs=in_specs,
        out_specs=pl.BlockSpec((None, bb, Dout), lambda b: (b, 0, 0)),
        compiler_params=pltpu.CompilerParams(
            dimension_semantics=("parallel",)),   # independent sequences -> 2 TCs on v7x
    )(x2, *weights, params['scal'])
    return out3.reshape(B, Dout)


# ------------------------------ parameter init ------------------------------

def init_params(key, cfg):
    H = cfg['hidden_dim']; Din = cfg['input_dim']; Dout = cfg['output_dim']
    Dstate = cfg['state_dim']; exp = cfg['expansion']
    d_inner = exp * H
    headdim = H
    nheads = d_inner // headdim
    d_in_proj = d_inner + 2 * Dstate + nheads
    padk = ((d_in_proj + 127) // 128) * 128       # merged in_proj padded to lane width
    nl = cfg['num_layers']
    keys = jax.random.split(key, 2 + nl)

    def lin_init(k, fan_in, fan_out, bias=True):
        kw, kb = jax.random.split(k)
        bound = 1.0 / math.sqrt(fan_in)
        w = jax.random.uniform(kw, (fan_in, fan_out), jnp.float32, -bound, bound)
        b = (jax.random.uniform(kb, (1, fan_out), jnp.float32, -bound, bound)
             if bias else None)
        return w, b

    enc_w, enc_b = lin_init(keys[0], Din, H)
    dec_w, dec_b = lin_init(keys[1], H, Dout)

    w_in_l, w_out_l, glu_w_l, glu_b_l, scal_l = [], [], [], [], []
    for i in range(nl):
        bk = jax.random.split(keys[2 + i], 5)
        in_w, _ = lin_init(bk[0], H, d_in_proj, bias=False)    # SSD in_proj, no bias
        out_w, _ = lin_init(bk[1], d_inner, H, bias=False)     # SSD out_proj, no bias
        g_w, g_b = lin_init(bk[2], H, 2 * H)                   # GLU linear
        dt_min, dt_max, dt_floor = 1e-3, 0.1, 1e-4
        u = jax.random.uniform(bk[3], (nheads,), jnp.float32)
        dt = jnp.exp(u * (math.log(dt_max) - math.log(dt_min)) + math.log(dt_min))
        dt = jnp.maximum(dt, dt_floor)
        dt_bias = dt + jnp.log(-jnp.expm1(-dt))                # inverse softplus
        a = jax.random.uniform(bk[4], (nheads,), jnp.float32, 1.0, 16.0)
        neg_A = -a                # forward uses A = -exp(A_log) = -a; precomputed here
        d_skip = jnp.ones((nheads,), jnp.float32)
        lam = jnp.ones((1,), jnp.float32)

        w_in_l.append(jnp.pad(in_w, ((0, 0), (0, padk - d_in_proj))))
        w_out_l.append(out_w)
        glu_w_l.append(g_w)
        glu_b_l.append(g_b)
        # SMEM scalar pack per layer: [dt_bias(h) | -exp(A_log)(h) | D(h) | lambd]
        scal_l.append(jnp.concatenate([dt_bias, neg_A, d_skip, lam]))

    return dict(
        enc_w=enc_w, enc_b=enc_b, dec_w=dec_w, dec_b=dec_b,
        ln_g=jnp.ones((nl, 1, H), jnp.float32),
        ln_b=jnp.zeros((nl, 1, H), jnp.float32),
        w_in=jnp.stack(w_in_l),          # (nl, H, padk)
        w_out=jnp.stack(w_out_l),        # (nl, d_inner, H)
        glu_w=jnp.stack(glu_w_l),        # (nl, H, 2H)
        glu_b=jnp.stack(glu_b_l),        # (nl, 1, 2H)
        scal=jnp.stack(scal_l),          # (nl, 3*nheads + 1), SMEM-resident
    )


# ----------------------------------- main ------------------------------------

if __name__ == "__main__":
    cfg = dict(version='mamba2', num_layers=2, input_dim=4, output_dim=6,
               hidden_dim=32, state_dim=16, conv_dim=4, expansion=1,
               dropout=0.0, glu=True, norm='layer', prenorm=True,
               dual=False, pooling='mean')
    # TODO(synk): 'mamba1' (MambaLayer conv path) and the dual=True MATCH head are
    # not defined in the provided source, so only the mamba2/SSD path is implemented.
    key = jax.random.PRNGKey(0)
    kp, kx = jax.random.split(key)
    params = init_params(kp, cfg)
    B, L = 2, 8
    x = jax.random.normal(kx, (B, L, cfg['input_dim']), dtype=jnp.float32)

    fwd = jax.jit(partial(mamba_forward, cfg=cfg))
    out = jax.block_until_ready(fwd(params, x))

    assert out.shape == (B, cfg['output_dim'])
    assert bool(jnp.all(jnp.isfinite(out)))
    assert bool(jnp.allclose(jnp.sum(out, axis=1), 1.0, atol=1e-4))
    print("KERNEL_OK")
</pallas_src>

<mosaic_0001>
module attributes {stable_mosaic.version = 11 : i64} {
  func.func @kernel(%arg0: i32, %arg1: memref<8x4xf32, #tpu.memory_space<vmem>>, %arg2: memref<4x32xf32, #tpu.memory_space<vmem>>, %arg3: memref<1x32xf32, #tpu.memory_space<vmem>>, %arg4: memref<2x1x32xf32, #tpu.memory_space<vmem>>, %arg5: memref<2x1x32xf32, #tpu.memory_space<vmem>>, %arg6: memref<2x32x128xf32, #tpu.memory_space<vmem>>, %arg7: memref<2x32x32xf32, #tpu.memory_space<vmem>>, %arg8: memref<2x32x64xf32, #tpu.memory_space<vmem>>, %arg9: memref<2x1x64xf32, #tpu.memory_space<vmem>>, %arg10: memref<32x6xf32, #tpu.memory_space<vmem>>, %arg11: memref<1x6xf32, #tpu.memory_space<vmem>>, %arg12: memref<2x4xf32, #tpu.memory_space<smem>>, %arg13: memref<1x1x6xf32, #tpu.memory_space<vmem>>) attributes {dimension_semantics = [#tpu.dimension_semantics<parallel>], iteration_bounds = array<i64: 2>, scalar_prefetch = 0 : i64, scratch_operands = 0 : i64, tpu.core_type = #tpu.core_type<tc>, window_params = [{transform_indices = @transform_0, window_bounds = array<i64: 8, 4>}, {pipeline_mode = #tpu.pipeline_mode<synchronous>, transform_indices = @transform_1, window_bounds = array<i64: 4, 32>}, {pipeline_mode = #tpu.pipeline_mode<synchronous>, transform_indices = @transform_2, window_bounds = array<i64: 1, 32>}, {pipeline_mode = #tpu.pipeline_mode<synchronous>, transform_indices = @transform_3, window_bounds = array<i64: 2, 1, 32>}, {pipeline_mode = #tpu.pipeline_mode<synchronous>, transform_indices = @transform_4, window_bounds = array<i64: 2, 1, 32>}, {pipeline_mode = #tpu.pipeline_mode<synchronous>, transform_indices = @transform_5, window_bounds = array<i64: 2, 32, 128>}, {pipeline_mode = #tpu.pipeline_mode<synchronous>, transform_indices = @transform_6, window_bounds = array<i64: 2, 32, 32>}, {pipeline_mode = #tpu.pipeline_mode<synchronous>, transform_indices = @transform_7, window_bounds = array<i64: 2, 32, 64>}, {pipeline_mode = #tpu.pipeline_mode<synchronous>, transform_indices = @transform_8, window_bounds = array<i64: 2, 1, 64>}, {pipeline_mode = #tpu.pipeline_mode<synchronous>, transform_indices = @transform_9, window_bounds = array<i64: 32, 6>}, {pipeline_mode = #tpu.pipeline_mode<synchronous>, transform_indices = @transform_10, window_bounds = array<i64: 1, 6>}, {transform_indices = @transform_11, window_bounds = array<i64: 2, 4>}, {transform_indices = @transform_12, window_bounds = array<i64: 1, 1, 6>}]} {
    %c0 = arith.constant 0 : index
    %c0_0 = arith.constant 0 : index
    %0 = vector.load %arg1[%c0, %c0_0] : memref<8x4xf32, #tpu.memory_space<vmem>>, vector<8x4xf32>
    %c0_1 = arith.constant 0 : index
    %c0_2 = arith.constant 0 : index
    %1 = vector.load %arg2[%c0_1, %c0_2] : memref<4x32xf32, #tpu.memory_space<vmem>>, vector<4x32xf32>
    %cst = arith.constant dense<0.000000e+00> : vector<8x32xf32>
    %2 = tpu.matmul %0, %1, %cst {dimension_numbers = #tpu.dot_dimension_numbers<[1], [0], [0], [1], [0, 0, 1, 1], [], []>} : vector<8x4xf32>, vector<4x32xf32>, vector<8x32xf32> -> vector<8x32xf32>
    %c0_3 = arith.constant 0 : index
    %c0_4 = arith.constant 0 : index
    %3 = vector.load %arg3[%c0_3, %c0_4] : memref<1x32xf32, #tpu.memory_space<vmem>>, vector<1x32xf32>
    %4 = vector.broadcast %3 : vector<1x32xf32> to vector<8x32xf32>
    %5 = arith.addf %2, %4 : vector<8x32xf32>
    %6 = tpu.iota {dimensions = array<i32: 0>} : vector<8x8xi32>
    %7 = tpu.iota {dimensions = array<i32: 1>} : vector<8x8xi32>
    %8 = arith.cmpi sle, %7, %6 : vector<8x8xi32>
    %9 = arith.extui %8 : vector<8x8xi1> to vector<8x8xi32>
    %10 = arith.sitofp %9 : vector<8x8xi32> to vector<8x8xf32>
    %c0_5 = arith.constant 0 : index
    %c3 = arith.constant 3 : index
    %11 = memref.load %arg12[%c0_5, %c3] : memref<2x4xf32, #tpu.memory_space<smem>>
    %12 = vector.broadcast %11 : f32 to vector<8x32xf32>
    %13 = arith.mulf %12, %5 : vector<8x32xf32>
    %c0_6 = arith.constant 0 : index
    %c0_7 = arith.constant 0 : index
    %c0_8 = arith.constant 0 : index
    %14 = vector.load %arg4[%c0_6, %c0_7, %c0_8] : memref<2x1x32xf32, #tpu.memory_space<vmem>>, vector<1x1x32xf32>
    %15 = vector.shape_cast %14 : vector<1x1x32xf32> to vector<1x32xf32>
    %c0_9 = arith.constant 0 : index
    %c0_10 = arith.constant 0 : index
    %c0_11 = arith.constant 0 : index
    %16 = vector.load %arg5[%c0_9, %c0_10, %c0_11] : memref<2x1x32xf32, #tpu.memory_space<vmem>>, vector<1x1x32xf32>
    %17 = vector.shape_cast %16 : vector<1x1x32xf32> to vector<1x32xf32>
    %cst_12 = arith.constant dense<0.000000e+00> : vector<8xf32>
    %18 = vector.multi_reduction <add>, %5, %cst_12 [1] : vector<8x32xf32> to vector<8xf32>
    %19 = vector.shape_cast %18 : vector<8xf32> to vector<8x1xf32>
    %cst_13 = arith.constant 3.200000e+01 : f32
    %20 = vector.broadcast %cst_13 : f32 to vector<8x1xf32>
    %21 = arith.divf %19, %20 : vector<8x1xf32>
    %22 = vector.broadcast %21 : vector<8x1xf32> to vector<8x32xf32>
    %23 = arith.subf %5, %22 : vector<8x32xf32>
    %24 = arith.mulf %23, %23 : vector<8x32xf32>
    %cst_14 = arith.constant dense<0.000000e+00> : vector<8xf32>
    %25 = vector.multi_reduction <add>, %24, %cst_14 [1] : vector<8x32xf32> to vector<8xf32>
    %26 = vector.shape_cast %25 : vector<8xf32> to vector<8x1xf32>
    %cst_15 = arith.constant 3.200000e+01 : f32
    %27 = vector.broadcast %cst_15 : f32 to vector<8x1xf32>
    %28 = arith.divf %26, %27 : vector<8x1xf32>
    %cst_16 = arith.constant 9.99999974E-6 : f32
    %29 = vector.broadcast %cst_16 : f32 to vector<8x1xf32>
    %30 = arith.addf %28, %29 : vector<8x1xf32>
    %31 = math.rsqrt %30 : vector<8x1xf32>
    %32 = vector.broadcast %31 : vector<8x1xf32> to vector<8x32xf32>
    %33 = arith.mulf %23, %32 : vector<8x32xf32>
    %34 = vector.broadcast %15 : vector<1x32xf32> to vector<8x32xf32>
    %35 = arith.mulf %33, %34 : vector<8x32xf32>
    %36 = vector.broadcast %17 : vector<1x32xf32> to vector<8x32xf32>
    %37 = arith.addf %35, %36 : vector<8x32xf32>
    %c0_17 = arith.constant 0 : index
    %c0_18 = arith.constant 0 : index
    %c0_19 = arith.constant 0 : index
    %38 = vector.load %arg6[%c0_17, %c0_18, %c0_19] : memref<2x32x128xf32, #tpu.memory_space<vmem>>, vector<1x32x128xf32>
    %39 = vector.shape_cast %38 : vector<1x32x128xf32> to vector<32x128xf32>
    %cst_20 = arith.constant dense<0.000000e+00> : vector<8x128xf32>
    %40 = tpu.matmul %37, %39, %cst_20 {dimension_numbers = #tpu.dot_dimension_numbers<[1], [0], [0], [1], [0, 0, 1, 1], [], []>} : vector<8x32xf32>, vector<32x128xf32>, vector<8x128xf32> -> vector<8x128xf32>
    %41 = vector.extract_strided_slice %40 {offsets = [0, 0], sizes = [8, 32], strides = [1, 1]} : vector<8x128xf32> to vector<8x32xf32>
    %42 = vector.extract_strided_slice %40 {offsets = [0, 32], sizes = [8, 16], strides = [1, 1]} : vector<8x128xf32> to vector<8x16xf32>
    %43 = vector.extract_strided_slice %40 {offsets = [0, 48], sizes = [8, 16], strides = [1, 1]} : vector<8x128xf32> to vector<8x16xf32>
    %44 = vector.extract_strided_slice %40 {offsets = [0, 64], sizes = [8, 1], strides = [1, 1]} : vector<8x128xf32> to vector<8x1xf32>
    %cst_21 = arith.constant dense<0.000000e+00> : vector<8x8xf32>
    %45 = tpu.matmul %43, %42, %cst_21 {dimension_numbers = #tpu.dot_dimension_numbers<[1], [1], [0], [0], [0, 0, 1, 0], [], []>} : vector<8x16xf32>, vector<8x16xf32>, vector<8x8xf32> -> vector<8x8xf32>
    %c0_22 = arith.constant 0 : index
    %c0_23 = arith.constant 0 : index
    %46 = memref.load %arg12[%c0_22, %c0_23] : memref<2x4xf32, #tpu.memory_space<smem>>
    %c0_24 = arith.constant 0 : index
    %c1 = arith.constant 1 : index
    %47 = memref.load %arg12[%c0_24, %c1] : memref<2x4xf32, #tpu.memory_space<smem>>
    %c0_25 = arith.constant 0 : index
    %c2 = arith.constant 2 : index
    %48 = memref.load %arg12[%c0_25, %c2] : memref<2x4xf32, #tpu.memory_space<smem>>
    %49 = vector.broadcast %46 : f32 to vector<8x1xf32>
    %50 = arith.addf %44, %49 : vector<8x1xf32>
    %cst_26 = arith.constant 0.000000e+00 : f32
    %51 = vector.broadcast %cst_26 : f32 to vector<8x1xf32>
    %52 = arith.maximumf %50, %51 : vector<8x1xf32>
    %53 = math.absf %50 : vector<8x1xf32>
    %cst_27 = arith.constant 0.000000e+00 : f32
    %54 = vector.broadcast %cst_27 : f32 to vector<8x1xf32>
    %55 = arith.subf %54, %53 : vector<8x1xf32>
    %56 = math.exp %55 : vector<8x1xf32>
    %cst_28 = arith.constant 1.000000e+00 : f32
    %57 = vector.broadcast %cst_28 : f32 to vector<8x1xf32>
    %58 = arith.addf %57, %56 : vector<8x1xf32>
    %59 = math.log %58 : vector<8x1xf32>
    %60 = arith.addf %52, %59 : vector<8x1xf32>
    %61 = vector.broadcast %47 : f32 to vector<8x1xf32>
    %62 = arith.mulf %60, %61 : vector<8x1xf32>
    %63 = tpu.transpose %62, [1, 0] : vector<8x1xf32> -> vector<1x8xf32>
    %64 = vector.broadcast %63 : vector<1x8xf32> to vector<8x8xf32>
    %65 = arith.mulf %10, %64 : vector<8x8xf32>
    %cst_29 = arith.constant dense<0.000000e+00> : vector<8xf32>
    %66 = vector.multi_reduction <add>, %65, %cst_29 [1] : vector<8x8xf32> to vector<8xf32>
    %67 = vector.shape_cast %66 : vector<8xf32> to vector<8x1xf32>
    %68 = tpu.transpose %67, [1, 0] : vector<8x1xf32> -> vector<1x8xf32>
    %69 = vector.broadcast %67 : vector<8x1xf32> to vector<8x8xf32>
    %70 = vector.broadcast %68 : vector<1x8xf32> to vector<8x8xf32>
    %71 = arith.subf %69, %70 : vector<8x8xf32>
    %cst_30 = arith.constant 0.000000e+00 : f32
    %72 = vector.broadcast %cst_30 : f32 to vector<8x8xf32>
    %73 = arith.select %8, %71, %72 : vector<8x8xi1>, vector<8x8xf32>
    %74 = math.exp %73 : vector<8x8xf32>
    %75 = arith.mulf %74, %10 : vector<8x8xf32>
    %76 = arith.mulf %45, %75 : vector<8x8xf32>
    %77 = tpu.transpose %60, [1, 0] : vector<8x1xf32> -> vector<1x8xf32>
    %78 = vector.broadcast %77 : vector<1x8xf32> to vector<8x8xf32>
    %79 = arith.mulf %76, %78 : vector<8x8xf32>
    %cst_31 = arith.constant dense<0.000000e+00> : vector<8x32xf32>
    %80 = tpu.matmul %79, %41, %cst_31 {dimension_numbers = #tpu.dot_dimension_numbers<[1], [0], [0], [1], [0, 0, 1, 1], [], []>} : vector<8x8xf32>, vector<8x32xf32>, vector<8x32xf32> -> vector<8x32xf32>
    %81 = vector.broadcast %48 : f32 to vector<8x32xf32>
    %82 = arith.mulf %81, %41 : vector<8x32xf32>
    %83 = arith.addf %80, %82 : vector<8x32xf32>
    %c0_32 = arith.constant 0 : index
    %c0_33 = arith.constant 0 : index
    %c0_34 = arith.constant 0 : index
    %84 = vector.load %arg7[%c0_32, %c0_33, %c0_34] : memref<2x32x32xf32, #tpu.memory_space<vmem>>, vector<1x32x32xf32>
    %85 = vector.shape_cast %84 : vector<1x32x32xf32> to vector<32x32xf32>
    %cst_35 = arith.constant dense<0.000000e+00> : vector<8x32xf32>
    %86 = tpu.matmul %83, %85, %cst_35 {dimension_numbers = #tpu.dot_dimension_numbers<[1], [0], [0], [1], [0, 0, 1, 1], [], []>} : vector<8x32xf32>, vector<32x32xf32>, vector<8x32xf32> -> vector<8x32xf32>
    %cst_36 = arith.constant 0.707106769 : f32
    %87 = vector.broadcast %cst_36 : f32 to vector<8x32xf32>
    %88 = arith.mulf %86, %87 : vector<8x32xf32>
    %89 = math.absf %88 : vector<8x32xf32>
    %cst_37 = arith.constant 0.327591091 : f32
    %90 = vector.broadcast %cst_37 : f32 to vector<8x32xf32>
    %91 = arith.mulf %90, %89 : vector<8x32xf32>
    %cst_38 = arith.constant 1.000000e+00 : f32
    %92 = vector.broadcast %cst_38 : f32 to vector<8x32xf32>
    %93 = arith.addf %92, %91 : vector<8x32xf32>
    %cst_39 = arith.constant 1.000000e+00 : f32
    %94 = vector.broadcast %cst_39 : f32 to vector<8x32xf32>
    %95 = arith.divf %94, %93 : vector<8x32xf32>
    %cst_40 = arith.constant 1.06140542 : f32
    %96 = vector.broadcast %cst_40 : f32 to vector<8x32xf32>
    %97 = arith.mulf %96, %95 : vector<8x32xf32>
    %cst_41 = arith.constant -1.45315206 : f32
    %98 = vector.broadcast %cst_41 : f32 to vector<8x32xf32>
    %99 = arith.addf %97, %98 : vector<8x32xf32>
    %100 = arith.mulf %99, %95 : vector<8x32xf32>
    %cst_42 = arith.constant 1.42141378 : f32
    %101 = vector.broadcast %cst_42 : f32 to vector<8x32xf32>
    %102 = arith.addf %100, %101 : vector<8x32xf32>
    %103 = arith.mulf %102, %95 : vector<8x32xf32>
    %cst_43 = arith.constant -0.284496725 : f32
    %104 = vector.broadcast %cst_43 : f32 to vector<8x32xf32>
    %105 = arith.addf %103, %104 : vector<8x32xf32>
    %106 = arith.mulf %105, %95 : vector<8x32xf32>
    %cst_44 = arith.constant 0.254829586 : f32
    %107 = vector.broadcast %cst_44 : f32 to vector<8x32xf32>
    %108 = arith.addf %106, %107 : vector<8x32xf32>
    %109 = arith.mulf %108, %95 : vector<8x32xf32>
    %cst_45 = arith.constant 0.000000e+00 : f32
    %110 = vector.broadcast %cst_45 : f32 to vector<8x32xf32>
    %111 = arith.subf %110, %89 : vector<8x32xf32>
    %112 = arith.mulf %111, %89 : vector<8x32xf32>
    %113 = math.exp %112 : vector<8x32xf32>
    %114 = arith.mulf %109, %113 : vector<8x32xf32>
    %cst_46 = arith.constant 1.000000e+00 : f32
    %115 = vector.broadcast %cst_46 : f32 to vector<8x32xf32>
    %116 = arith.subf %115, %114 : vector<8x32xf32>
    %cst_47 = arith.constant 0.000000e+00 : f32
    %117 = vector.broadcast %cst_47 : f32 to vector<8x32xf32>
    %118 = arith.cmpf oge, %88, %117 : vector<8x32xf32>
    %cst_48 = arith.constant 0.000000e+00 : f32
    %119 = vector.broadcast %cst_48 : f32 to vector<8x32xf32>
    %120 = arith.subf %119, %116 : vector<8x32xf32>
    %121 = arith.select %118, %116, %120 : vector<8x32xi1>, vector<8x32xf32>
    %cst_49 = arith.constant 5.000000e-01 : f32
    %122 = vector.broadcast %cst_49 : f32 to vector<8x32xf32>
    %123 = arith.mulf %122, %86 : vector<8x32xf32>
    %cst_50 = arith.constant 1.000000e+00 : f32
    %124 = vector.broadcast %cst_50 : f32 to vector<8x32xf32>
    %125 = arith.addf %124, %121 : vector<8x32xf32>
    %126 = arith.mulf %123, %125 : vector<8x32xf32>
    %c0_51 = arith.constant 0 : index
    %c0_52 = arith.constant 0 : index
    %c0_53 = arith.constant 0 : index
    %127 = vector.load %arg8[%c0_51, %c0_52, %c0_53] : memref<2x32x64xf32, #tpu.memory_space<vmem>>, vector<1x32x64xf32>
    %128 = vector.shape_cast %127 : vector<1x32x64xf32> to vector<32x64xf32>
    %cst_54 = arith.constant dense<0.000000e+00> : vector<8x64xf32>
    %129 = tpu.matmul %126, %128, %cst_54 {dimension_numbers = #tpu.dot_dimension_numbers<[1], [0], [0], [1], [0, 0, 1, 1], [], []>} : vector<8x32xf32>, vector<32x64xf32>, vector<8x64xf32> -> vector<8x64xf32>
    %c0_55 = arith.constant 0 : index
    %c0_56 = arith.constant 0 : index
    %c0_57 = arith.constant 0 : index
    %130 = vector.load %arg9[%c0_55, %c0_56, %c0_57] : memref<2x1x64xf32, #tpu.memory_space<vmem>>, vector<1x1x64xf32>
    %131 = vector.shape_cast %130 : vector<1x1x64xf32> to vector<1x64xf32>
    %132 = vector.broadcast %131 : vector<1x64xf32> to vector<8x64xf32>
    %133 = arith.addf %129, %132 : vector<8x64xf32>
    %134 = vector.extract_strided_slice %133 {offsets = [0, 0], sizes = [8, 32], strides = [1, 1]} : vector<8x64xf32> to vector<8x32xf32>
    %135 = vector.extract_strided_slice %133 {offsets = [0, 32], sizes = [8, 32], strides = [1, 1]} : vector<8x64xf32> to vector<8x32xf32>
    %cst_58 = arith.constant 0.000000e+00 : f32
    %136 = vector.broadcast %cst_58 : f32 to vector<8x32xf32>
    %137 = arith.subf %136, %135 : vector<8x32xf32>
    %138 = math.exp %137 : vector<8x32xf32>
    %cst_59 = arith.constant 1.000000e+00 : f32
    %139 = vector.broadcast %cst_59 : f32 to vector<8x32xf32>
    %140 = arith.addf %139, %138 : vector<8x32xf32>
    %cst_60 = arith.constant 1.000000e+00 : f32
    %141 = vector.broadcast %cst_60 : f32 to vector<8x32xf32>
    %142 = arith.divf %141, %140 : vector<8x32xf32>
    %143 = arith.mulf %134, %142 : vector<8x32xf32>
    %144 = arith.addf %143, %13 : vector<8x32xf32>
    %c1_61 = arith.constant 1 : index
    %c3_62 = arith.constant 3 : index
    %145 = memref.load %arg12[%c1_61, %c3_62] : memref<2x4xf32, #tpu.memory_space<smem>>
    %146 = vector.broadcast %145 : f32 to vector<8x32xf32>
    %147 = arith.mulf %146, %144 : vector<8x32xf32>
    %c1_63 = arith.constant 1 : index
    %c0_64 = arith.constant 0 : index
    %c0_65 = arith.constant 0 : index
    %148 = vector.load %arg4[%c1_63, %c0_64, %c0_65] : memref<2x1x32xf32, #tpu.memory_space<vmem>>, vector<1x1x32xf32>
    %149 = vector.shape_cast %148 : vector<1x1x32xf32> to vector<1x32xf32>
    %c1_66 = arith.constant 1 : index
    %c0_67 = arith.constant 0 : index
    %c0_68 = arith.constant 0 : index
    %150 = vector.load %arg5[%c1_66, %c0_67, %c0_68] : memref<2x1x32xf32, #tpu.memory_space<vmem>>, vector<1x1x32xf32>
    %151 = vector.shape_cast %150 : vector<1x1x32xf32> to vector<1x32xf32>
    %cst_69 = arith.constant dense<0.000000e+00> : vector<8xf32>
    %152 = vector.multi_reduction <add>, %144, %cst_69 [1] : vector<8x32xf32> to vector<8xf32>
    %153 = vector.shape_cast %152 : vector<8xf32> to vector<8x1xf32>
    %cst_70 = arith.constant 3.200000e+01 : f32
    %154 = vector.broadcast %cst_70 : f32 to vector<8x1xf32>
    %155 = arith.divf %153, %154 : vector<8x1xf32>
    %156 = vector.broadcast %155 : vector<8x1xf32> to vector<8x32xf32>
    %157 = arith.subf %144, %156 : vector<8x32xf32>
    %158 = arith.mulf %157, %157 : vector<8x32xf32>
    %cst_71 = arith.constant dense<0.000000e+00> : vector<8xf32>
    %159 = vector.multi_reduction <add>, %158, %cst_71 [1] : vector<8x32xf32> to vector<8xf32>
    %160 = vector.shape_cast %159 : vector<8xf32> to vector<8x1xf32>
    %cst_72 = arith.constant 3.200000e+01 : f32
    %161 = vector.broadcast %cst_72 : f32 to vector<8x1xf32>
    %162 = arith.divf %160, %161 : vector<8x1xf32>
    %cst_73 = arith.constant 9.99999974E-6 : f32
    %163 = vector.broadcast %cst_73 : f32 to vector<8x1xf32>
    %164 = arith.addf %162, %163 : vector<8x1xf32>
    %165 = math.rsqrt %164 : vector<8x1xf32>
    %166 = vector.broadcast %165 : vector<8x1xf32> to vector<8x32xf32>
    %167 = arith.mulf %157, %166 : vector<8x32xf32>
    %168 = vector.broadcast %149 : vector<1x32xf32> to vector<8x32xf32>
    %169 = arith.mulf %167, %168 : vector<8x32xf32>
    %170 = vector.broadcast %151 : vector<1x32xf32> to vector<8x32xf32>
    %171 = arith.addf %169, %170 : vector<8x32xf32>
    %c1_74 = arith.constant 1 : index
    %c0_75 = arith.constant 0 : index
    %c0_76 = arith.constant 0 : index
    %172 = vector.load %arg6[%c1_74, %c0_75, %c0_76] : memref<2x32x128xf32, #tpu.memory_space<vmem>>, vector<1x32x128xf32>
    %173 = vector.shape_cast %172 : vector<1x32x128xf32> to vector<32x128xf32>
    %cst_77 = arith.constant dense<0.000000e+00> : vector<8x128xf32>
    %174 = tpu.matmul %171, %173, %cst_77 {dimension_numbers = #tpu.dot_dimension_numbers<[1], [0], [0], [1], [0, 0, 1, 1], [], []>} : vector<8x32xf32>, vector<32x128xf32>, vector<8x128xf32> -> vector<8x128xf32>
    %175 = vector.extract_strided_slice %174 {offsets = [0, 0], sizes = [8, 32], strides = [1, 1]} : vector<8x128xf32> to vector<8x32xf32>
    %176 = vector.extract_strided_slice %174 {offsets = [0, 32], sizes = [8, 16], strides = [1, 1]} : vector<8x128xf32> to vector<8x16xf32>
    %177 = vector.extract_strided_slice %174 {offsets = [0, 48], sizes = [8, 16], strides = [1, 1]} : vector<8x128xf32> to vector<8x16xf32>
    %178 = vector.extract_strided_slice %174 {offsets = [0, 64], sizes = [8, 1], strides = [1, 1]} : vector<8x128xf32> to vector<8x1xf32>
    %cst_78 = arith.constant dense<0.000000e+00> : vector<8x8xf32>
    %179 = tpu.matmul %177, %176, %cst_78 {dimension_numbers = #tpu.dot_dimension_numbers<[1], [1], [0], [0], [0, 0, 1, 0], [], []>} : vector<8x16xf32>, vector<8x16xf32>, vector<8x8xf32> -> vector<8x8xf32>
    %c1_79 = arith.constant 1 : index
    %c0_80 = arith.constant 0 : index
    %180 = memref.load %arg12[%c1_79, %c0_80] : memref<2x4xf32, #tpu.memory_space<smem>>
    %c1_81 = arith.constant 1 : index
    %c1_82 = arith.constant 1 : index
    %181 = memref.load %arg12[%c1_81, %c1_82] : memref<2x4xf32, #tpu.memory_space<smem>>
    %c1_83 = arith.constant 1 : index
    %c2_84 = arith.constant 2 : index
    %182 = memref.load %arg12[%c1_83, %c2_84] : memref<2x4xf32, #tpu.memory_space<smem>>
    %183 = vector.broadcast %180 : f32 to vector<8x1xf32>
    %184 = arith.addf %178, %183 : vector<8x1xf32>
    %cst_85 = arith.constant 0.000000e+00 : f32
    %185 = vector.broadcast %cst_85 : f32 to vector<8x1xf32>
    %186 = arith.maximumf %184, %185 : vector<8x1xf32>
    %187 = math.absf %184 : vector<8x1xf32>
    %cst_86 = arith.constant 0.000000e+00 : f32
    %188 = vector.broadcast %cst_86 : f32 to vector<8x1xf32>
    %189 = arith.subf %188, %187 : vector<8x1xf32>
    %190 = math.exp %189 : vector<8x1xf32>
    %cst_87 = arith.constant 1.000000e+00 : f32
    %191 = vector.broadcast %cst_87 : f32 to vector<8x1xf32>
    %192 = arith.addf %191, %190 : vector<8x1xf32>
    %193 = math.log %192 : vector<8x1xf32>
    %194 = arith.addf %186, %193 : vector<8x1xf32>
    %195 = vector.broadcast %181 : f32 to vector<8x1xf32>
    %196 = arith.mulf %194, %195 : vector<8x1xf32>
    %197 = tpu.transpose %196, [1, 0] : vector<8x1xf32> -> vector<1x8xf32>
    %198 = vector.broadcast %197 : vector<1x8xf32> to vector<8x8xf32>
    %199 = arith.mulf %10, %198 : vector<8x8xf32>
    %cst_88 = arith.constant dense<0.000000e+00> : vector<8xf32>
    %200 = vector.multi_reduction <add>, %199, %cst_88 [1] : vector<8x8xf32> to vector<8xf32>
    %201 = vector.shape_cast %200 : vector<8xf32> to vector<8x1xf32>
    %202 = tpu.transpose %201, [1, 0] : vector<8x1xf32> -> vector<1x8xf32>
    %203 = vector.broadcast %201 : vector<8x1xf32> to vector<8x8xf32>
    %204 = vector.broadcast %202 : vector<1x8xf32> to vector<8x8xf32>
    %205 = arith.subf %203, %204 : vector<8x8xf32>
    %cst_89 = arith.constant 0.000000e+00 : f32
    %206 = vector.broadcast %cst_89 : f32 to vector<8x8xf32>
    %207 = arith.select %8, %205, %206 : vector<8x8xi1>, vector<8x8xf32>
    %208 = math.exp %207 : vector<8x8xf32>
    %209 = arith.mulf %208, %10 : vector<8x8xf32>
    %210 = arith.mulf %179, %209 : vector<8x8xf32>
    %211 = tpu.transpose %194, [1, 0] : vector<8x1xf32> -> vector<1x8xf32>
    %212 = vector.broadcast %211 : vector<1x8xf32> to vector<8x8xf32>
    %213 = arith.mulf %210, %212 : vector<8x8xf32>
    %cst_90 = arith.constant dense<0.000000e+00> : vector<8x32xf32>
    %214 = tpu.matmul %213, %175, %cst_90 {dimension_numbers = #tpu.dot_dimension_numbers<[1], [0], [0], [1], [0, 0, 1, 1], [], []>} : vector<8x8xf32>, vector<8x32xf32>, vector<8x32xf32> -> vector<8x32xf32>
    %215 = vector.broadcast %182 : f32 to vector<8x32xf32>
    %216 = arith.mulf %215, %175 : vector<8x32xf32>
    %217 = arith.addf %214, %216 : vector<8x32xf32>
    %c1_91 = arith.constant 1 : index
    %c0_92 = arith.constant 0 : index
    %c0_93 = arith.constant 0 : index
    %218 = vector.load %arg7[%c1_91, %c0_92, %c0_93] : memref<2x32x32xf32, #tpu.memory_space<vmem>>, vector<1x32x32xf32>
    %219 = vector.shape_cast %218 : vector<1x32x32xf32> to vector<32x32xf32>
    %cst_94 = arith.constant dense<0.000000e+00> : vector<8x32xf32>
    %220 = tpu.matmul %217, %219, %cst_94 {dimension_numbers = #tpu.dot_dimension_numbers<[1], [0], [0], [1], [0, 0, 1, 1], [], []>} : vector<8x32xf32>, vector<32x32xf32>, vector<8x32xf32> -> vector<8x32xf32>
    %cst_95 = arith.constant 0.707106769 : f32
    %221 = vector.broadcast %cst_95 : f32 to vector<8x32xf32>
    %222 = arith.mulf %220, %221 : vector<8x32xf32>
    %223 = math.absf %222 : vector<8x32xf32>
    %cst_96 = arith.constant 0.327591091 : f32
    %224 = vector.broadcast %cst_96 : f32 to vector<8x32xf32>
    %225 = arith.mulf %224, %223 : vector<8x32xf32>
    %cst_97 = arith.constant 1.000000e+00 : f32
    %226 = vector.broadcast %cst_97 : f32 to vector<8x32xf32>
    %227 = arith.addf %226, %225 : vector<8x32xf32>
    %cst_98 = arith.constant 1.000000e+00 : f32
    %228 = vector.broadcast %cst_98 : f32 to vector<8x32xf32>
    %229 = arith.divf %228, %227 : vector<8x32xf32>
    %cst_99 = arith.constant 1.06140542 : f32
    %230 = vector.broadcast %cst_99 : f32 to vector<8x32xf32>
    %231 = arith.mulf %230, %229 : vector<8x32xf32>
    %cst_100 = arith.constant -1.45315206 : f32
    %232 = vector.broadcast %cst_100 : f32 to vector<8x32xf32>
    %233 = arith.addf %231, %232 : vector<8x32xf32>
    %234 = arith.mulf %233, %229 : vector<8x32xf32>
    %cst_101 = arith.constant 1.42141378 : f32
    %235 = vector.broadcast %cst_101 : f32 to vector<8x32xf32>
    %236 = arith.addf %234, %235 : vector<8x32xf32>
    %237 = arith.mulf %236, %229 : vector<8x32xf32>
    %cst_102 = arith.constant -0.284496725 : f32
    %238 = vector.broadcast %cst_102 : f32 to vector<8x32xf32>
    %239 = arith.addf %237, %238 : vector<8x32xf32>
    %240 = arith.mulf %239, %229 : vector<8x32xf32>
    %cst_103 = arith.constant 0.254829586 : f32
    %241 = vector.broadcast %cst_103 : f32 to vector<8x32xf32>
    %242 = arith.addf %240, %241 : vector<8x32xf32>
    %243 = arith.mulf %242, %229 : vector<8x32xf32>
    %cst_104 = arith.constant 0.000000e+00 : f32
    %244 = vector.broadcast %cst_104 : f32 to vector<8x32xf32>
    %245 = arith.subf %244, %223 : vector<8x32xf32>
    %246 = arith.mulf %245, %223 : vector<8x32xf32>
    %247 = math.exp %246 : vector<8x32xf32>
    %248 = arith.mulf %243, %247 : vector<8x32xf32>
    %cst_105 = arith.constant 1.000000e+00 : f32
    %249 = vector.broadcast %cst_105 : f32 to vector<8x32xf32>
    %250 = arith.subf %249, %248 : vector<8x32xf32>
    %cst_106 = arith.constant 0.000000e+00 : f32
    %251 = vector.broadcast %cst_106 : f32 to vector<8x32xf32>
    %252 = arith.cmpf oge, %222, %251 : vector<8x32xf32>
    %cst_107 = arith.constant 0.000000e+00 : f32
    %253 = vector.broadcast %cst_107 : f32 to vector<8x32xf32>
    %254 = arith.subf %253, %250 : vector<8x32xf32>
    %255 = arith.select %252, %250, %254 : vector<8x32xi1>, vector<8x32xf32>
    %cst_108 = arith.constant 5.000000e-01 : f32
    %256 = vector.broadcast %cst_108 : f32 to vector<8x32xf32>
    %257 = arith.mulf %256, %220 : vector<8x32xf32>
    %cst_109 = arith.constant 1.000000e+00 : f32
    %258 = vector.broadcast %cst_109 : f32 to vector<8x32xf32>
    %259 = arith.addf %258, %255 : vector<8x32xf32>
    %260 = arith.mulf %257, %259 : vector<8x32xf32>
    %c1_110 = arith.constant 1 : index
    %c0_111 = arith.constant 0 : index
    %c0_112 = arith.constant 0 : index
    %261 = vector.load %arg8[%c1_110, %c0_111, %c0_112] : memref<2x32x64xf32, #tpu.memory_space<vmem>>, vector<1x32x64xf32>
    %262 = vector.shape_cast %261 : vector<1x32x64xf32> to vector<32x64xf32>
    %cst_113 = arith.constant dense<0.000000e+00> : vector<8x64xf32>
    %263 = tpu.matmul %260, %262, %cst_113 {dimension_numbers = #tpu.dot_dimension_numbers<[1], [0], [0], [1], [0, 0, 1, 1], [], []>} : vector<8x32xf32>, vector<32x64xf32>, vector<8x64xf32> -> vector<8x64xf32>
    %c1_114 = arith.constant 1 : index
    %c0_115 = arith.constant 0 : index
    %c0_116 = arith.constant 0 : index
    %264 = vector.load %arg9[%c1_114, %c0_115, %c0_116] : memref<2x1x64xf32, #tpu.memory_space<vmem>>, vector<1x1x64xf32>
    %265 = vector.shape_cast %264 : vector<1x1x64xf32> to vector<1x64xf32>
    %266 = vector.broadcast %265 : vector<1x64xf32> to vector<8x64xf32>
    %267 = arith.addf %263, %266 : vector<8x64xf32>
    %268 = vector.extract_strided_slice %267 {offsets = [0, 0], sizes = [8, 32], strides = [1, 1]} : vector<8x64xf32> to vector<8x32xf32>
    %269 = vector.extract_strided_slice %267 {offsets = [0, 32], sizes = [8, 32], strides = [1, 1]} : vector<8x64xf32> to vector<8x32xf32>
    %cst_117 = arith.constant 0.000000e+00 : f32
    %270 = vector.broadcast %cst_117 : f32 to vector<8x32xf32>
    %271 = arith.subf %270, %269 : vector<8x32xf32>
    %272 = math.exp %271 : vector<8x32xf32>
    %cst_118 = arith.constant 1.000000e+00 : f32
    %273 = vector.broadcast %cst_118 : f32 to vector<8x32xf32>
    %274 = arith.addf %273, %272 : vector<8x32xf32>
    %cst_119 = arith.constant 1.000000e+00 : f32
    %275 = vector.broadcast %cst_119 : f32 to vector<8x32xf32>
    %276 = arith.divf %275, %274 : vector<8x32xf32>
    %277 = arith.mulf %268, %276 : vector<8x32xf32>
    %278 = arith.addf %277, %147 : vector<8x32xf32>
    %279 = vector.shape_cast %278 : vector<8x32xf32> to vector<1x8x32xf32>
    %cst_120 = arith.constant dense<0.000000e+00> : vector<1x32xf32>
    %280 = vector.multi_reduction <add>, %279, %cst_120 [1] : vector<1x8x32xf32> to vector<1x32xf32>
    %cst_121 = arith.constant 1.250000e-01 : f32
    %281 = vector.broadcast %cst_121 : f32 to vector<1x32xf32>
    %282 = arith.mulf %280, %281 : vector<1x32xf32>
    %c0_122 = arith.constant 0 : index
    %c0_123 = arith.constant 0 : index
    %283 = vector.load %arg10[%c0_122, %c0_123] : memref<32x6xf32, #tpu.memory_space<vmem>>, vector<32x6xf32>
    %cst_124 = arith.constant dense<0.000000e+00> : vector<1x6xf32>
    %284 = tpu.matmul %282, %283, %cst_124 {dimension_numbers = #tpu.dot_dimension_numbers<[1], [0], [0], [1], [0, 0, 1, 1], [], []>} : vector<1x32xf32>, vector<32x6xf32>, vector<1x6xf32> -> vector<1x6xf32>
    %c0_125 = arith.constant 0 : index
    %c0_126 = arith.constant 0 : index
    %285 = vector.load %arg11[%c0_125, %c0_126] : memref<1x6xf32, #tpu.memory_space<vmem>>, vector<1x6xf32>
    %286 = arith.addf %284, %285 : vector<1x6xf32>
    %cst_127 = arith.constant dense<0xFF800000> : vector<1xf32>
    %287 = vector.multi_reduction <maximumf>, %286, %cst_127 [1] : vector<1x6xf32> to vector<1xf32>
    %288 = vector.shape_cast %287 : vector<1xf32> to vector<1x1xf32>
    %289 = vector.broadcast %288 : vector<1x1xf32> to vector<1x6xf32>
    %290 = arith.subf %286, %289 : vector<1x6xf32>
    %291 = math.exp %290 : vector<1x6xf32>
    %cst_128 = arith.constant dense<0.000000e+00> : vector<1xf32>
    %292 = vector.multi_reduction <add>, %291, %cst_128 [1] : vector<1x6xf32> to vector<1xf32>
    %293 = vector.shape_cast %292 : vector<1xf32> to vector<1x1xf32>
    %294 = vector.broadcast %293 : vector<1x1xf32> to vector<1x6xf32>
    %295 = arith.divf %291, %294 : vector<1x6xf32>
    %c0_129 = arith.constant 0 : index
    %c0_130 = arith.constant 0 : index
    %c0_131 = arith.constant 0 : index
    %296 = vector.load %arg13[%c0_129, %c0_130, %c0_131] : memref<1x1x6xf32, #tpu.memory_space<vmem>>, vector<1x1x6xf32>
    %297 = vector.shape_cast %296 : vector<1x1x6xf32> to vector<1x6xf32>
    %298 = vector.shape_cast %295 : vector<1x6xf32> to vector<1x1x6xf32>
    tpu.vector_store %arg13[%c0_129, %c0_130, %c0_131], %298 {strides = array<i32>} : memref<1x1x6xf32, #tpu.memory_space<vmem>>, vector<1x1x6xf32>,
    return
  }
  func.func @transform_0(%arg0: i32) -> (i32, i32) {
    %c0_i32 = arith.constant 0 : i32
    %c0_i32_0 = arith.constant 0 : i32
    return %arg0, %c0_i32 : i32, i32
  }
  func.func @transform_1(%arg0: i32) -> (i32, i32) {
    %c0_i32 = arith.constant 0 : i32
    %c0_i32_0 = arith.constant 0 : i32
    %c0_i32_1 = arith.constant 0 : i32
    return %c0_i32, %c0_i32_0 : i32, i32
  }
  func.func @transform_2(%arg0: i32) -> (i32, i32) {
    %c0_i32 = arith.constant 0 : i32
    %c0_i32_0 = arith.constant 0 : i32
    %c0_i32_1 = arith.constant 0 : i32
    return %c0_i32, %c0_i32_0 : i32, i32
  }
  func.func @transform_3(%arg0: i32) -> (i32, i32, i32) {
    %c0_i32 = arith.constant 0 : i32
    %c0_i32_0 = arith.constant 0 : i32
    %c0_i32_1 = arith.constant 0 : i32
    %c0_i32_2 = arith.constant 0 : i32
    return %c0_i32, %c0_i32_0, %c0_i32_1 : i32, i32, i32
  }
  func.func @transform_4(%arg0: i32) -> (i32, i32, i32) {
    %c0_i32 = arith.constant 0 : i32
    %c0_i32_0 = arith.constant 0 : i32
    %c0_i32_1 = arith.constant 0 : i32
    %c0_i32_2 = arith.constant 0 : i32
    return %c0_i32, %c0_i32_0, %c0_i32_1 : i32, i32, i32
  }
  func.func @transform_5(%arg0: i32) -> (i32, i32, i32) {
    %c0_i32 = arith.constant 0 : i32
    %c0_i32_0 = arith.constant 0 : i32
    %c0_i32_1 = arith.constant 0 : i32
    %c0_i32_2 = arith.constant 0 : i32
    return %c0_i32, %c0_i32_0, %c0_i32_1 : i32, i32, i32
  }
  func.func @transform_6(%arg0: i32) -> (i32, i32, i32) {
    %c0_i32 = arith.constant 0 : i32
    %c0_i32_0 = arith.constant 0 : i32
    %c0_i32_1 = arith.constant 0 : i32
    %c0_i32_2 = arith.constant 0 : i32
    return %c0_i32, %c0_i32_0, %c0_i32_1 : i32, i32, i32
  }
  func.func @transform_7(%arg0: i32) -> (i32, i32, i32) {
    %c0_i32 = arith.constant 0 : i32
    %c0_i32_0 = arith.constant 0 : i32
    %c0_i32_1 = arith.constant 0 : i32
    %c0_i32_2 = arith.constant 0 : i32
    return %c0_i32, %c0_i32_0, %c0_i32_1 : i32, i32, i32
  }
  func.func @transform_8(%arg0: i32) -> (i32, i32, i32) {
    %c0_i32 = arith.constant 0 : i32
    %c0_i32_0 = arith.constant 0 : i32
    %c0_i32_1 = arith.constant 0 : i32
    %c0_i32_2 = arith.constant 0 : i32
    return %c0_i32, %c0_i32_0, %c0_i32_1 : i32, i32, i32
  }
  func.func @transform_9(%arg0: i32) -> (i32, i32) {
    %c0_i32 = arith.constant 0 : i32
    %c0_i32_0 = arith.constant 0 : i32
    %c0_i32_1 = arith.constant 0 : i32
    return %c0_i32, %c0_i32_0 : i32, i32
  }
  func.func @transform_10(%arg0: i32) -> (i32, i32) {
    %c0_i32 = arith.constant 0 : i32
    %c0_i32_0 = arith.constant 0 : i32
    %c0_i32_1 = arith.constant 0 : i32
    return %c0_i32, %c0_i32_0 : i32, i32
  }
  func.func @transform_11(%arg0: i32) -> (i32, i32) {
    %c0_i32 = arith.constant 0 : i32
    %c0_i32_0 = arith.constant 0 : i32
    %c0_i32_1 = arith.constant 0 : i32
    return %c0_i32, %c0_i32_0 : i32, i32
  }
  func.func @transform_12(%arg0: i32) -> (i32, i32, i32) {
    %c0_i32 = arith.constant 0 : i32
    %c0_i32_0 = arith.constant 0 : i32
    %c0_i32_1 = arith.constant 0 : i32
    return %arg0, %c0_i32, %c0_i32_0 : i32, i32, i32
  }
}

</mosaic_0001>

<bundles_post_ra>
// kernel: mamba_forward.1
= control target key start
LH: loop header
LB: loop body
LE: loop exit
PB: predicated region body
PF: predicated region fallthrough
CT: control target
= control target key end

     0   :  { %s2938_s0 = inlined_call_operand.vmem [shape: f32[16,4], index: 0, kind: input, shape index: {}]   ;;  %s2939_s1 = inlined_call_operand.vmem [shape: f32[4,32], index: 1, kind: input, shape index: {}]   ;;  %s2940_s2 = inlined_call_operand.vmem [shape: f32[1,32], index: 2, kind: input, shape index: {}]   ;;  %s2941_s3 = inlined_call_operand.vmem [shape: f32[2,1,32], index: 3, kind: input, shape index: {}]   ;;  %s2942_s4 = inlined_call_operand.vmem [shape: f32[2,1,32], index: 4, kind: input, shape index: {}]   ;;  %s2943_s5 = inlined_call_operand.vmem [shape: f32[2,32,128], index: 5, kind: input, shape index: {}]   ;;  %s2944_s6 = inlined_call_operand.hbm [shape: f32[2,32,32], index: 6, kind: input, shape index: {}]   ;;  %s2945_s7 = inlined_call_operand.hbm [shape: f32[2,32,64], index: 7, kind: input, shape index: {}]   ;;  %s2946_s8 = inlined_call_operand.vmem [shape: f32[2,1,64], index: 8, kind: input, shape index: {}]   ;;  %s2947_s9 = inlined_call_operand.vmem [shape: f32[32,6], index: 9, kind: input, shape index: {}]   ;;  %s2948_s10 = inlined_call_operand.vmem [shape: f32[1,6], index: 10, kind: input, shape index: {}]   ;;  %s2949_s11 = inlined_call_operand.vmem [shape: f32[2,4], index: 11, kind: input, shape index: {}]   ;;  %s2950_s12 = inlined_call_operand.hbm [shape: f32[2,1,6], index: 12, kind: output, shape index: {}]  }
   0x1   :  { %2959 = sst [smem:[#allocation20_spill]] %s2949_s11 }
   0x2   :  { %2960 = sst [smem:[#allocation21_spill]] %s2950_s12 }
   0x3   :  { %17 = vsyncpa [#allocation3], 0 }
   0x4   :  { %18 = vsyncpa [#allocation7], 0 }
   0x5   :  { %19 = vsyncpa [#allocation5], 0 }
   0x6   :  { %20 = vsyncpa [#allocation4], 0 }
   0x7   :  { %22 = vsyncpa [#allocation4 + $0x1], 0  ;;  %s2547_s21 = smov 0   ;;  %s2549_s22 = smov 0  }
   0x8   :  { %s2551_s23 = smov 0   ;;  %s2553_s24 = smov 0  }
   0x9 LB: > { %2961 = sst [smem:[#allocation14_spill]] %s2456_s21  ;;  %s2568_s25 = sadd.s32 4294967295, %s2468_s24   ;;  %s2468_s24 = sphi %s2553_s24, %s2984_s24   ;;  %s2464_s23 = sphi %s2551_s23, %s2986_s23   ;;  %s2460_s22 = sphi %s2549_s22, %s2988_s22   ;;  %s2456_s21 = sphi %s2547_s21, %s2987_s21  }
   0xa   : > { %2962 = sst [smem:[#allocation15_spill]] %s2464_s23  ;;  %s1969_s26 = sadd.s32 4294967294, %s2468_s24  }
   0xb   : > { %2963 = sst [smem:[#allocation16_spill]] %s2468_s24  ;;  %s2572_s27 = sadd.s32 1, %s2468_s24  }
   0xc   : > { %2964 = sst [smem:[#allocation17_spill]] %s2572_s27  ;;  %s292_s28 = sadd.s32 1, %s2464_s23 }
   0xd   : > { %s289_s29 = ssub.s32 %s2468_s24, %s2572_s27  ;;  %p302_p0 = scmp.ne.s32.totalorder %s2464_s23, %s2460_s22 }
   0xe   : > { %p290_p1 = scmp.eq.s32.totalorder %s289_s29, 0  ;;  %p303_p2 = scmp.eq.s32.totalorder %s2568_s25, 1 }
   0xf   : > { %p308_p3 = scmp.ne.s32.totalorder %s2460_s22, %s2456_s21  ;;  %p309_p4 = scmp.eq.s32.totalorder %s1969_s26, 1 }
  0x10   : > { %s2583_s30 = scalar_select %p290_p1, %s2464_s23, %s292_s28  }
  0x11   : > { %p2585_p5 = por %p303_p2, %p302_p0  ;;  %p2589_p6 = por %p309_p4, %p308_p3 }
  0x12   : > { %2965 = sst [smem:[#allocation18_spill]] %s2583_s30  ;;  %p1970_p7 = scmp.ge.s32.totalorder %s2468_s24, 1 }
  0x13   : > { %s2967_s14 = scalar_select %p2589_p6, 1, 0 }
  0x14   : > { %p316_p8 = scmp.lt.s32.totalorder %s2468_s24, 3  ;;  %p2956_p9 = scmp.eq.s32.totalorder %s2568_s25, 0 }
  0x15   : > { %2968 = sst [smem:[#allocation19_spill]] %s2967_s14  ;;  %s2470_s16 = smov [#allocation2]  }
  0x16   : > { %p2596_p10 = pnand %p1970_p7, %p316_p8  ;;  %s343_s17 = sshll.u32 %s2470_s16, 4  ;;  %s2602_s17 = int_to_ptr.vmem [resolvable:$true] %s343_s17 }
  0x17   : > { %s2471_s19 = smov [#allocation6]   ;;  %s2971_s11 = sld [smem:[#allocation20_spill]] }
  0x18   : > { %p2223_p11 = pneg %p2596_p10  ;;  %s356_s20 = sshll.u32 %s2471_s19, 4  ;;  %s2610_s20 = int_to_ptr.vmem [resolvable:$true] %s356_s20 }
  0x19   : > { %s2323_s23 = scalar_lea.hbm %s2944_s6, 1024 }
  0x1a   : > { %p2606_p12 = pnand %p2956_p9, %p2223_p11  ;;  %p2324_p13 = scmp.ne.s32.totalorder %s2944_s6, %s2323_s23 }
  0x1b   : > { %p2330_p3 = scmp.lt.u32.totalorder %s2323_s23, %s2944_s6 }
  0x1c   : > { %p2625_p0 = pneg %p2606_p12 }
  0x1d   : > { %s379_s29 = sshll.u32 %s2971_s11, 4  ;;  %s2615_s29 = int_to_ptr.vmem [resolvable:$true] %s379_s29 }
  0x1e   : > { %p2326_p1 = pnand %p2625_p0, %p2324_p13 }
  0x20   : > { %p2327_p2 = pneg %p2326_p1 }
  0x22   : > { %p2332_p4 = pnand %p2330_p3, %p2327_p2 }
  0x24   : > { %2335 = shalt.err (!%p2332_p4)
}
  0x25   : > { %s2336_s27 = scalar_lea.vmem %s2602_s17, 1024  ;;  %p2344_p9 = scmp.lt.s32.totalorder %s2602_s17, %s2602_s17 }
  0x26   : > { %p2337_p7 = scmp.ne.s32.totalorder %s2602_s17, %s2336_s27  ;;  %p2345_p6 = scmp.lt.s32.totalorder %s2336_s27, %s2336_s27 }
  0x28   : > { %p2339_p8 = pnand %p2337_p7, %p2625_p0  ;;  %p2346_p13 = por %p2345_p6, %p2344_p9 }
  0x2a   : > { %p2340_p11 = pneg %p2339_p8 }
  0x2c   : > { %p2347_p1 = pnand %p2346_p13, %p2340_p11 }
  0x2e   : > { %2350 = shalt.err (!%p2347_p1)
}
  0x2f   : > { %s2472_s30 = smov 128   ;;  %s2473_s23 = smov 8  }
  0x30   : > { %2226 = dma.hbm_to_vmem [thread:$0]  (!%p2606_p12), %s2944_s6, 1024, %s2602_s17, [#allocation3], %s2472_s30, %s2472_s30, %s2473_s23  }
  0x31   : > { %s2351_s26 = scalar_lea.hbm %s2945_s7, 1024 }
  0x32   : > { %p2352_p6 = scmp.ne.s32.totalorder %s2945_s7, %s2351_s26  ;;  %p2358_p3 = scmp.lt.u32.totalorder %s2351_s26, %s2945_s7 }
  0x34   : > { %p2354_p9 = pnand %p2352_p6, %p2625_p0 }
  0x36   : > { %p2355_p2 = pneg %p2354_p9 }
  0x38   : > { %p2360_p4 = pnand %p2358_p3, %p2355_p2 }
  0x3a   : > { %2363 = shalt.err (!%p2360_p4)
}
  0x3b   : > { %s2364_s17 = scalar_lea.vmem %s2610_s20, 1024  ;;  %p2372_p13 = scmp.lt.s32.totalorder %s2610_s20, %s2610_s20 }
  0x3c   : > { %p2365_p7 = scmp.ne.s32.totalorder %s2610_s20, %s2364_s17  ;;  %p2373_p1 = scmp.lt.s32.totalorder %s2364_s17, %s2364_s17 }
  0x3e   : > { %p2367_p8 = pnand %p2365_p7, %p2625_p0  ;;  %p2374_p6 = por %p2373_p1, %p2372_p13 }
  0x40   : > { %p2368_p11 = pneg %p2367_p8 }
  0x42   : > { %p2375_p9 = pnand %p2374_p6, %p2368_p11 }
  0x44   : > { %2378 = shalt.err (!%p2375_p9)
}
  0x45   : > { %2229 = dma.hbm_to_vmem [thread:$0]  (!%p2606_p12), %s2945_s7, 1024, %s2610_s20, [#allocation7], %s2472_s30, %s2472_s30, %s2473_s23  }
  0x46   : > { %s2379_s24 = scalar_lea.vmem %s2615_s29, 32  ;;  %p2387_p7 = scmp.lt.s32.totalorder %s2615_s29, %s2615_s29 }
  0x47   : > { %p2380_p2 = scmp.ne.s32.totalorder %s2615_s29, %s2379_s24  ;;  %p2388_p8 = scmp.lt.s32.totalorder %s2379_s24, %s2379_s24 }
  0x49   : > { %p2382_p3 = pnand %p2380_p2, %p2625_p0  ;;  %p2389_p11 = por %p2388_p8, %p2387_p7 }
  0x4b   : > { %p2383_p4 = pneg %p2382_p3 }
  0x4d   : > { %p2390_p13 = pnand %p2389_p11, %p2383_p4 }
  0x4f   : > { %2393 = shalt.err (!%p2390_p13)
}
  0x50   : > { %s2474_s14 = smov [#allocation8]   ;;  %399 = sbr.rel (%p2596_p10) target bundleno = 4759 (0x1297), region = 68 }
  0x51   : > { %2232 = dma.vmem_to_smem (!%p2606_p12), %s2615_s29, 32, %s2474_s14, [#allocation5]  }
  0x52   : > { %p2973_p1 = scmp.eq.s32.totalorder (!%p2596_p10), %s2568_s25, 0 }
  0x57   : > { %2439 = dma.done.wait (%p2973_p1), [#allocation3], 1024   ;;  %p2974_p0 = pmov %p2973_p1 }
  0x59   : > { %2441 = vsyncadd (%p2974_p0), [#allocation3], 4294966272  ;;  %p2975_p6 = pmov %p2974_p0 }
  0x5a   : > { %p2976_p9 = pmov %p2974_p0 }
  0x5b   : > { %2443 = dma.done.wait (%p2975_p6), [#allocation7], 1024  }
  0x5c   : > { %2445 = vsyncadd (%p2976_p9), [#allocation7], 4294966272  ;;  %p2977_p2 = pmov %p2974_p0 }
  0x5d   : > { %p2978_p12 = pmov %p2974_p0 }
  0x5e   : > { %2447 = dma.done.wait (%p2977_p2), [#allocation5], 32  }
  0x5f   : > { %2449 = vsyncadd (%p2978_p12), [#allocation5], 4294967264 }
  0x60   : > { %413 = sfence }
  0x61   : > { %v453_v0 = vld [vmem:[%s2939_s1] sm:$0xf]  ;;  %vm465_vm0 = vcmask 1043456   ;;  %p448_p10 = scmp.lt.s32.totalorder %s2568_s25, 1  ;;  %v2475_v1 = vmov 0.0   ;;  %vm2476_vm1 = vmmov 0   ;;  %v539_v47 = vlaneseq }
  0x62   : > { %2065 = vmatprep.subr.mxu0 %v2475_v1  ;;  %2067 = vmatprep.mubr.msk.f32.mxu0 %vm2476_vm1, %v2475_v1  ;;  %vm461_vm2 = vcmask 31744   ;;  %v1980_v3 = vld [vmem:[%s2940_s2] ss:$0 sm:$0xff]  ;;  %vm551_vm3 = vcmask 261120   ;;  %v581_v14 = vld [vmem:[%s2943_s5 + $0x8] sm:$0xff]  ;;  %v582_v15 = vld [vmem:[%s2943_s5 + $0x10] sm:$0xff] }
  0x63   : > { %2066 = vmatpush3.msk.msra.mxu0 %vm465_vm0, %v453_v0  ;;  %s449_s18 = scalar_select %p448_p10, %s2568_s25, 1  ;;  %2078 = vmatprep.mubr.msk.f32.mxu1 %vm2476_vm1, %v2475_v1  ;;  %v580_v13 = vld [vmem:[%s2943_s5] sm:$0xff]  ;;  %v2477_v16 = vmov 0.0|0.0   ;;  %v583_v18 = vld [vmem:[%s2943_s5 + $0x18] sm:$0xff]  ;;  %vm662_vm4 = vcmask 130048   ;;  %v2757_v48 = vshrl.u32 %v539_v47, 7 }
  0x64   : > { %2081 = vmatprep.subr.mxu0 %v2475_v1  ;;  %2167 = vmatprep.subr.bf16.mxu1 %v2477_v16  ;;  %v2168_v17 = vpack.c.bf16 %v581_v14, %v580_v13  ;;  %v2171_v19 = vpack.c.bf16 %v583_v18, %v582_v15  ;;  %v1985_v24 = vld [vmem:[%s2941_s3] ss:$0 sm:$0xff]  ;;  %s737_s29 = sld [smem:[#allocation8]]  ;;  %s2478_s30 = smov 96   ;;  %v2759_v49 = vand.u32 127, %v539_v47  ;;  %vm794_vm6 = vcmask 64512  }
  0x65   : > { %s1979_s20 = sshll.u32 %s449_s18, 3  ;;  %v1986_v26 = vld [vmem:[%s2942_s4] ss:$0 sm:$0xff]  ;;  %s1990_s28 = sld [smem:[#allocation8 + $0x1]]  ;;  %v2762_v50 = vsub.s32 0, %v2757_v48  ;;  %v957_v61 = vld [vmem:[#allocation2 + $0x8] sm:$0xff] }
  0x66   : > { %s451_s23 = scalar_lea.vmem %s2938_s0, %s1979_s20  ;;  %2169 = vmatpush3.bf16.msra.mxu1 %v2168_v17  ;;  %s2480_s16 = smov 64   ;;  %vm543_vm5 = vcmp.le.s32.totalorder %v2759_v49, %v2757_v48  ;;  %v956_v60 = vld [vmem:[#allocation2] sm:$0xff]  ;;  %v959_v13 = vld [vmem:[#allocation2 + $0x18] sm:$0xff]  ;;  %vm1854_vm9 = vcmask 40960  }
  0x67   : > { %v452_v2 = vld [vmem:[%s451_s23] sm:$0xff]  ;;  %2170 = vmatprep.subr.bf16.mxu1 %v2477_v16  ;;  %s2479_s23 = smov 80   ;;  %v2770_v52 = vsel %vm543_vm5, 1.0, %v2475_v1  ;;  %v2174_v62 = vpack.c.bf16 %v957_v61, %v956_v60  ;;  %s1991_s19 = sld [smem:[#allocation8 + $0x2]] }
  0x68   : > { %2068 = vmatmul.mubr.msk.f32.vlgmr.msra.gmra.mrb[0].mxu0 %vm461_vm2, %v452_v2  ;;  %s1984_s17 = sld [smem:[#allocation8 + $0x3]]  ;;  %s2008_s27 = sld [smem:[#allocation8 + $0x80]] }
  0x69   : > { %2083 = vmatprep.mubr.msk.f32.mxu0 %vm2476_vm1, %v2475_v1  ;;  %s446_s26 = sand.u32 1, %s2460_s22   ;;  %s2979_s12 = sld [smem:[#allocation21_spill]] }
  0x6a   : > { %2172 = vmatpush3.bf16.msra.mxu1 %v2171_v19  ;;  %v740_v29 = vstv %s737_s29  ;;  %s1868_s14 = scalar_lea.sflag [#allocation4], %s446_s26 }
  0x6b   : > { %2173 = vmatprep.subr.bf16.mxu1 %v2477_v16  ;;  %v751_v41 = vstv %s1990_s28  ;;  %s1996_s28 = sld [smem:[#allocation8 + $0x83]] }
  0x6d   : > { %v881_v15 = vstv %s1991_s19 }
 0x13b   : > { %v535_v4 = vpop.f32.mrb[0].mxu0 }
 0x13c   : > { %v2711_v5 = vadd.f32 %v1980_v3, %v535_v4  ;;  %v2069_v6 = vpop.f32.mrb[1].mxu0 }
 0x13e   : > { %v552_v7 = vsel %vm551_vm3, %v2711_v5, 0.0 }
 0x13f   : > { %553 = vadd.xlane.f32.xlu0 %v552_v7 }
 0x1cc   : > { %v554_v8 = vpop.xlane.xlu0 %553 }
 0x1cd   : > { %v556_v9 = vmul.f32 0.03125, %v554_v8 }
 0x1cf   : > { %v557_v10 = vsub.f32 %v2711_v5, %v556_v9 }
 0x1d1   : > { %v558_v11 = vmul.f32 %v557_v10, %v557_v10 }
 0x1d3   : > { %v559_v12 = vsel %vm551_vm3, %v558_v11, 0.0 }
 0x1d4   : > { %560 = vadd.xlane.f32.xlu0 %v559_v12  ;;  %v958_v12 = vld [vmem:[#allocation2 + $0x10] sm:$0xff] }
 0x1d5   : > { %v2177_v14 = vpack.c.bf16 %v959_v13, %v958_v12 }
 0x261   : > { %v561_v20 = vpop.xlane.xlu0 %560 }
 0x262   : > { %v562_v21 = vmul.f32 0.03125, %v561_v20 }
 0x264   : > { %v563_v22 = vadd.f32 1e-05, %v562_v21  ;;  %v1060_v21 = vld [vmem:[#allocation6] sm:$0xff] }
 0x266   : > { %2287 = vrsqrt.f32 %v563_v22  ;;  %v1061_v22 = vld [vmem:[#allocation6 + $0x8] sm:$0xff] }
 0x270   : > { %v2288_v23 = vpop.eup %2287 }
 0x271   : > { %v565_v25 = vmul.f32 %v2288_v23, %v557_v10  ;;  %v2180_v23 = vpack.c.bf16 %v1061_v22, %v1060_v21 }
 0x273   : > { %v572_v27 = vmul.f32 %v1985_v24, %v565_v25  ;;  %v1062_v24 = vld [vmem:[#allocation6 + $0x10] sm:$0xff]  ;;  %v1063_v25 = vld [vmem:[#allocation6 + $0x18] sm:$0xff] }
 0x275   : > { %v579_v28 = vadd.f32 %v1986_v26, %v572_v27  ;;  %v2183_v26 = vpack.c.bf16 %v1063_v25, %v1062_v24 }
 0x277   : > { %2079 = vmatmul.mubr.msk.f32.vlgmr.msra.gmra.mrb[0].mxu1 %vm551_vm3, %v579_v28 }
 0x278   : > { %2099 = vmatprep.mubr.msk.f32.mxu1 %vm2476_vm1, %v2475_v1  ;;  %2175 = vmatpush3.bf16.msra.mxu1 %v2174_v62 }
 0x279   : > { %2176 = vmatprep.subr.bf16.mxu1 %v2477_v16 }
 0x27c   : > { %2178 = vmatpush3.bf16.msra.mxu1 %v2177_v14 }
 0x27d   : > { %2185 = vmatprep.subr.bf16.mxu1 %v2477_v16 }
 0x34a   : > { %v2741_v30 = vpop.f32.mrb[0].mxu1 }
 0x34b   : > { %v741_v31 = vadd.f32 %v740_v29, %v2741_v30  ;;  %660 = vrot.lane.b32.xlu1 %v2741_v30, %s2478_s30  ;;  %v2080_v32 = vpop.f32.mrb[1].mxu1  ;;  %v882_v17 = vmul.f32 %v881_v15, %v2741_v30 }
 0x34d   : > { %v743_v33 = vand.u32 2147483647, %v741_v31  ;;  %v742_v39 = vmax.f32 %v741_v31, 0.0 }
 0x34f   : > { %v744_v34 = vsub.f32 0.0, %v743_v33  ;;  %658 = vrot.lane.b32.xlu1 %v2741_v30, %s2479_s23 }
 0x351   : > { %v745_v35 = vmul.f32 1.442695, %v744_v34 }
 0x353   : > { %2289 = vpow2.f32 %v745_v35 }
 0x35d   : > { %v2290_v36 = vpop.eup %2289 }
 0x35e   : > { %v747_v37 = vadd.f32 1.0, %v2290_v36 }
 0x360   : > { %2291 = vlog2.f32 %v747_v37 }
 0x36a   : > { %v2292_v38 = vpop.eup %2291 }
 0x36b   : > { %v749_v40 = vmul.f32 0.6931472, %v2292_v38 }
 0x36d   : > { %v750_v42 = vadd.f32 %v749_v40, %v742_v39 }
 0x36f   : > { %v752_v43 = vmul.f32 %v751_v41, %v750_v42 }
 0x371   : > { %754 = vrot.lane.b32.xlu0 %v752_v43, %s2480_s16 }
 0x3bd   : > { %v661_v44 = vpop.permute.xlu1 %660 }
 0x3be   : > { %2082 = vmatpush3.xpose.msk.msra.mxu0 %vm662_vm4, %v661_v44 }
 0x3bf   : > { %2086 = vmatprep.subr.mxu0 %v2475_v1 }
 0x3c1   : > { %v659_v45 = vpop.permute.xlu1 %658 }
 0x3c2   : > { %2084 = vmatmul.mubr.msk.f32.vlgmr.msra.gmra.mrb[2].mxu0 %vm662_vm4, %v659_v45 }
 0x3c3   : > { %2087 = vmatpush3.msra.mxu0 %v2741_v30  ;;  %2088 = vmatprep.mubr.msk.f32.mxu0 %vm2476_vm1, %v2475_v1 }
 0x3c4   : > { %2179 = vmatprep.subr.bf16.mxu0 %v2477_v16 }
 0x3e3   : > { %v755_v46 = vpop.permute.xlu0 %754 }
 0x3e4   : > { %757 = vxpose.xlu1.b32.start.end [1/1] (short) (narrow) %v755_v46, 8 }
 0x402   : > { %841 = vrot.lane.b32.xlu1 %v750_v42, %s2480_s16 }
 0x464   : > { %v773_v51 = vpop.trf.xlu1 }
 0x465   : > { %v792_v53 = vrot.slane %v773_v51, %v2762_v50 }
 0x467   : > { %v793_v54 = vmul.f32 %v2770_v52, %v792_v53 }
 0x469   : > { %v795_v55 = vsel %vm794_vm6, %v793_v54, 0.0 }
 0x46a   : > { %796 = vadd.xlane.f32.xlu0 %v795_v55 }
 0x474   : > { %v842_v56 = vpop.permute.xlu1 %841 }
 0x475   : > { %844 = vxpose.xlu1.b32.start.end [1/1] (short) (narrow) %v842_v56, 8 }
 0x495   : > { %v733_v57 = vpop.f32.mrb[2].mxu0 }
 0x496   : > { %v2085_v58 = vpop.f32.mrb[3].mxu0 }
 0x497   : > { %v1994_v58 = vld [vmem:[%s2946_s8] ss:$0 sm:$0xff] }
 0x4f5   : > { %v860_v6 = vpop.trf.xlu1 }
 0x4f6   : > { %v879_v9 = vrot.slane %v860_v6, %v2762_v50 }
 0x4f7   : > { %v797_v59 = vpop.xlane.xlu0 %796 }
 0x4f8   : > { %798 = vxpose.xlu0.b32.start.end [1/1] (short) (narrow) %v797_v59, 8 }
 0x578   : > { %v814_v63 = vpop.trf.xlu0 }
 0x579   : > { %v833_v0 = vrot.slane %v814_v63, %v2762_v50 }
 0x57b   : > { %v834_v2 = vsub.f32 %v797_v59, %v833_v0 }
 0x57d   : > { %v835_v3 = vsel %vm543_vm5, %v834_v2, 0.0 }
 0x57e   : > { %v836_v4 = vmul.f32 1.442695, %v835_v3 }
 0x580   : > { %2293 = vpow2.f32 %v836_v4  ;;  %v547_v4 = vstv %s1984_s17  ;;  %s2009_s17 = sld [smem:[#allocation8 + $0x81]] }
 0x58a   : > { %v2294_v7 = vpop.eup %2293 }
 0x58b   : > { %v838_v8 = vmul.f32 %v2294_v7, %v2770_v52  ;;  %v548_v7 = vmul.f32 %v547_v4, %v2711_v5  ;;  %v2002_v5 = vld [vmem:[%s2943_s5 + $0x28] sm:$0xff] }
 0x58d   : > { %v839_v10 = vmul.f32 %v838_v8, %v733_v57 }
 0x58f   : > { %v880_v11 = vmul.f32 %v879_v9, %v839_v10 }
 0x591   : > { %2089 = vmatmul.mubr.msk.f32.vlgmr.msra.gmra.mrb[4].mxu0 %vm794_vm6, %v880_v11 }
 0x592   : > { %2110 = vmatprep.mubr.msk.f32.mxu0 %vm2476_vm1, %v2475_v1  ;;  %2181 = vmatpush3.bf16.msra.mxu0 %v2180_v23 }
 0x593   : > { %2182 = vmatprep.subr.bf16.mxu0 %v2477_v16 }
 0x596   : > { %2184 = vmatpush3.bf16.msra.mxu0 %v2183_v26  ;;  %v1999_v26 = vld [vmem:[%s2941_s3 + $0x1] ss:$0 sm:$0xff] }
 0x597   : > { %2124 = vmatprep.subr.mxu0 %v2475_v1 }
 0x664   : > { %v952_v18 = vpop.f32.mrb[4].mxu0 }
 0x665   : > { %v953_v19 = vadd.f32 %v952_v18, %v882_v17  ;;  %v2090_v20 = vpop.f32.mrb[5].mxu0  ;;  %v2001_v17 = vld [vmem:[%s2943_s5 + $0x20] sm:$0xff] }
 0x666   : > { %v2186_v18 = vpack.c.bf16 %v2002_v5, %v2001_v17  ;;  %v2004_v20 = vld [vmem:[%s2943_s5 + $0x38] sm:$0xff] }
 0x667   : > { %2100 = vmatmul.mubr.msk.f32.vlgmr.msra.gmra.mrb[2].mxu1 %vm551_vm3, %v953_v19  ;;  %v2003_v19 = vld [vmem:[%s2943_s5 + $0x30] sm:$0xff] }
 0x668   : > { %2121 = vmatprep.mubr.msk.f32.mxu1 %vm2476_vm1, %v2475_v1  ;;  %2187 = vmatpush3.bf16.msra.mxu1 %v2186_v18  ;;  %v2189_v21 = vpack.c.bf16 %v2004_v20, %v2003_v19  ;;  %v1671_v18 = vld [vmem:[#allocation6 + $0x20] sm:$0xff]  ;;  %v1672_v19 = vld [vmem:[#allocation6 + $0x28] sm:$0xff] }
 0x669   : > { %2188 = vmatprep.subr.bf16.mxu1 %v2477_v16  ;;  %v2198_v20 = vpack.c.bf16 %v1672_v19, %v1671_v18 }
 0x66c   : > { %2190 = vmatpush3.bf16.msra.mxu1 %v2189_v21  ;;  %v1673_v21 = vld [vmem:[#allocation6 + $0x30] sm:$0xff] }
 0x66d   : > { %2191 = vmatprep.subr.bf16.mxu1 %v2477_v16 }
 0x73a   : > { %v1029_v27 = vpop.f32.mrb[2].mxu1 }
 0x73b   : > { %v1033_v28 = vmul.f32 0.70710677, %v1029_v27  ;;  %v2101_v29 = vpop.f32.mrb[3].mxu1  ;;  %v1057_v55 = vmul.f32 0.5, %v1029_v27 }
 0x73d   : > { %v1034_v30 = vand.u32 2147483647, %v1033_v28  ;;  %vm1054_vm7 = vcmp.ge.f32.partialorder %v1033_v28, 0.0  ;;  %v2000_v28 = vld [vmem:[%s2942_s4 + $0x1] ss:$0 sm:$0xff] }
 0x73f   : > { %v1035_v31 = vmul.f32 0.3275911, %v1034_v30  ;;  %v1048_v33 = vsub.f32 0.0, %v1034_v30 }
 0x741   : > { %v1036_v32 = vadd.f32 1.0, %v1035_v31  ;;  %v1049_v35 = vmul.f32 %v1048_v33, %v1034_v30  ;;  %v1350_v31 = vstv %s2008_s27  ;;  %s2017_s27 = sshll.u32 %s2568_s25, 4  ;;  %s2481_s25 = smov [#allocation9]  }
 0x742   : > { %s2895_s24 = scalar_lea.hbm %s2979_s12, %s2017_s27  ;;  %s2398_s15 = sshll.u32 %s2481_s25, 4  ;;  %s2399_s15 = int_to_ptr.vmem [resolvable:$false] %s2398_s15 }
 0x743   : > { %2295 = vrcp.f32 %v1036_v32  ;;  %v1050_v38 = vmul.f32 1.442695, %v1049_v35  ;;  %s2400_s18 = scalar_lea.vmem %s2399_s15, 32 }
 0x745   : > { %2297 = vpow2.f32 %v1050_v38 }
 0x74d   : > { %v2296_v34 = vpop.eup %2295 }
 0x74e   : > { %v1039_v36 = vmul.f32 1.0614054, %v2296_v34 }
 0x74f   : > { %v2298_v46 = vpop.eup %2297 }
 0x750   : > { %v1040_v37 = vadd.f32 -1.4531521, %v1039_v36 }
 0x752   : > { %v1041_v39 = vmul.f32 %v2296_v34, %v1040_v37 }
 0x754   : > { %v1042_v40 = vadd.f32 1.4214138, %v1041_v39 }
 0x756   : > { %v1043_v41 = vmul.f32 %v2296_v34, %v1042_v40 }
 0x758   : > { %v1044_v42 = vadd.f32 -0.28449672, %v1043_v41 }
 0x75a   : > { %v1045_v43 = vmul.f32 %v2296_v34, %v1044_v42 }
 0x75c   : > { %v1046_v44 = vadd.f32 0.2548296, %v1045_v43  ;;  %v1361_v43 = vstv %s2009_s17  ;;  %s447_s17 = scalar_lea.vmem [#allocation9], %s446_s26 }
 0x75e   : > { %v1047_v45 = vmul.f32 %v2296_v34, %v1046_v44 }
 0x760   : > { %v1052_v47 = vmul.f32 %v2298_v46, %v1047_v45 }
 0x762   : > { %v1053_v51 = vsub.f32 1.0, %v1052_v47 }
 0x764   : > { %v1055_v53 = vsub.f32 0.0, %v1053_v51 }
 0x766   : > { %v1056_v54 = vsel %vm1054_vm7, %v1053_v51, %v1055_v53 }
 0x767   : > { %v1058_v56 = vadd.f32 1.0, %v1056_v54 }
 0x769   : > { %v1059_v57 = vmul.f32 %v1058_v56, %v1057_v55 }
 0x76b   : > { %2111 = vmatmul.mubr.msk.f32.vlgmr.msra.gmra.mrb[6].mxu0 %vm551_vm3, %v1059_v57 }
 0x76c   : > { %2126 = vmatprep.mubr.msk.f32.mxu0 %vm2476_vm1, %v2475_v1 }
 0x83e   : > { %v1140_v59 = vpop.f32.mrb[6].mxu0 }
 0x83f   : > { %v1141_v60 = vadd.f32 %v1994_v58, %v1140_v59  ;;  %v2112_v61 = vpop.f32.mrb[7].mxu0 }
 0x840   : > { %v1566_v61 = vld [vmem:[#allocation2 + $0x20] sm:$0xff] }
 0x841   : > { %v1144_v62 = vsub.f32 0.0, %v1141_v60 }
 0x843   : > { %v1145_v63 = vmul.f32 1.442695, %v1144_v62  ;;  %v1567_v62 = vld [vmem:[#allocation2 + $0x28] sm:$0xff] }
 0x845   : > { %2299 = vpow2.f32 %v1145_v63  ;;  %v2192_v63 = vpack.c.bf16 %v1567_v62, %v1566_v61  ;;  %v1776_v62 = vld [vmem:[%s2947_s9] sm:$0xff] }
 0x84f   : > { %v2300_v0 = vpop.eup %2299 }
 0x850   : > { %v1147_v2 = vadd.f32 1.0, %v2300_v0 }
 0x852   : > { %2301 = vrcp.f32 %v1147_v2 }
 0x85c   : > { %v2302_v3 = vpop.eup %2301 }
 0x85d   : > { %1151 = vrot.lane.b32.xlu0 %v2302_v3, %s2478_s30 }
 0x8cf   : > { %v1152_v6 = vpop.permute.xlu0 %1151 }
 0x8d0   : > { %v1154_v8 = vmul.f32 %v1152_v6, %v1141_v60 }
 0x8d2   : > { %v2800_v9 = vadd.f32 %v1154_v8, %v548_v7 }
 0x8d4   : > { %v1163_v10 = vsel %vm551_vm3, %v2800_v9, 0.0 }
 0x8d5   : > { %1164 = vadd.xlane.f32.xlu1 %v1163_v10 }
 0x962   : > { %v1165_v11 = vpop.xlane.xlu1 %1164 }
 0x963   : > { %v1166_v12 = vmul.f32 0.03125, %v1165_v11 }
 0x965   : > { %v1167_v13 = vsub.f32 %v2800_v9, %v1166_v12 }
 0x967   : > { %v1168_v14 = vmul.f32 %v1167_v13, %v1167_v13 }
 0x969   : > { %v1169_v15 = vsel %vm551_vm3, %v1168_v14, 0.0  ;;  %v1568_v14 = vld [vmem:[#allocation2 + $0x30] sm:$0xff] }
 0x96a   : > { %1170 = vadd.xlane.f32.xlu0 %v1169_v15  ;;  %v1569_v15 = vld [vmem:[#allocation2 + $0x38] sm:$0xff] }
 0x96b   : > { %v2195_v17 = vpack.c.bf16 %v1569_v15, %v1568_v14 }
 0x9f7   : > { %v1171_v22 = vpop.xlane.xlu0 %1170 }
 0x9f8   : > { %v1172_v23 = vmul.f32 0.03125, %v1171_v22  ;;  %v1674_v22 = vld [vmem:[#allocation6 + $0x38] sm:$0xff] }
 0x9fa   : > { %v1173_v24 = vadd.f32 1e-05, %v1172_v23  ;;  %v2201_v23 = vpack.c.bf16 %v1674_v22, %v1673_v21 }
 0x9fc   : > { %2303 = vrsqrt.f32 %v1173_v24 }
 0xa06   : > { %v2304_v25 = vpop.eup %2303 }
 0xa07   : > { %v1175_v27 = vmul.f32 %v2304_v25, %v1167_v13 }
 0xa09   : > { %v1182_v29 = vmul.f32 %v1999_v26, %v1175_v27 }
 0xa0b   : > { %v1189_v30 = vadd.f32 %v2000_v28, %v1182_v29 }
 0xa0d   : > { %2122 = vmatmul.mubr.msk.f32.vlgmr.msra.gmra.mrb[4].mxu1 %vm551_vm3, %v1189_v30 }
 0xa0e   : > { %2142 = vmatprep.mubr.msk.f32.mxu1 %vm2476_vm1, %v2475_v1  ;;  %2193 = vmatpush3.bf16.msra.mxu1 %v2192_v63  ;;  %v1777_v63 = vld [vmem:[%s2947_s9 + $0x8] sm:$0xff] }
 0xa0f   : > { %2194 = vmatprep.subr.bf16.mxu1 %v2477_v16 }
 0xa12   : > { %2196 = vmatpush3.bf16.msra.mxu1 %v2195_v17 }
 0xa13   : > { %2203 = vmatprep.subr.bf16.mxu1 %v2477_v16 }
 0xae0   : > { %v2829_v32 = vpop.f32.mrb[4].mxu1 }
 0xae1   : > { %v1351_v33 = vadd.f32 %v1350_v31, %v2829_v32  ;;  %1271 = vrot.lane.b32.xlu1 %v2829_v32, %s2478_s30  ;;  %v2123_v34 = vpop.f32.mrb[5].mxu1 }
 0xae3   : > { %v1353_v35 = vand.u32 2147483647, %v1351_v33  ;;  %v1352_v41 = vmax.f32 %v1351_v33, 0.0 }
 0xae5   : > { %v1354_v36 = vsub.f32 0.0, %v1353_v35  ;;  %1269 = vrot.lane.b32.xlu1 %v2829_v32, %s2479_s23  ;;  %s2010_s23 = sld [smem:[#allocation8 + $0x82]] }
 0xae7   : > { %v1355_v37 = vmul.f32 1.442695, %v1354_v36 }
 0xae9   : > { %2305 = vpow2.f32 %v1355_v37 }
 0xaeb   : > { %v1490_v48 = vstv %s2010_s23  ;;  %s1880_s23 = sshll.u32 %s447_s17, 4  ;;  %s2897_s23 = int_to_ptr.vmem [resolvable:$true] %s1880_s23 }
 0xaec   : > { %v1491_v49 = vmul.f32 %v1490_v48, %v2829_v32  ;;  %s2394_s21 = scalar_lea.vmem %s2897_s23, 16  ;;  %p2401_p8 = scmp.lt.s32.totalorder %s2897_s23, %s2399_s15 }
 0xaed   : > { %p2395_p3 = scmp.ne.s32.totalorder %s2897_s23, %s2394_s21  ;;  %p2402_p11 = scmp.lt.s32.totalorder %s2400_s18, %s2394_s21 }
 0xaef   : > { %p2396_p4 = pnand %p2395_p3, %p2585_p5  ;;  %p2403_p13 = por %p2402_p11, %p2401_p8 }
 0xaf1   : > { %p2397_p7 = pneg %p2396_p4 }
 0xaf3   : > { %v2306_v38 = vpop.eup %2305  ;;  %p2404_p1 = pnand %p2403_p13, %p2397_p7 }
 0xaf4   : > { %v1357_v39 = vadd.f32 1.0, %v2306_v38 }
 0xaf6   : > { %2307 = vlog2.f32 %v1357_v39 }
 0xb00   : > { %v2308_v40 = vpop.eup %2307 }
 0xb01   : > { %v1359_v42 = vmul.f32 0.6931472, %v2308_v40 }
 0xb03   : > { %v1360_v44 = vadd.f32 %v1359_v42, %v1352_v41 }
 0xb05   : > { %v1362_v45 = vmul.f32 %v1361_v43, %v1360_v44 }
 0xb07   : > { %1364 = vrot.lane.b32.xlu0 %v1362_v45, %s2480_s16 }
 0xb53   : > { %v1272_v46 = vpop.permute.xlu1 %1271 }
 0xb54   : > { %2125 = vmatpush3.xpose.msk.msra.mxu0 %vm662_vm4, %v1272_v46 }
 0xb55   : > { %2129 = vmatprep.subr.mxu0 %v2475_v1 }
 0xb57   : > { %v1270_v47 = vpop.permute.xlu1 %1269 }
 0xb58   : > { %2127 = vmatmul.mubr.msk.f32.vlgmr.msra.gmra.mrb[8].mxu0 %vm662_vm4, %v1270_v47 }
 0xb59   : > { %2130 = vmatpush3.msra.mxu0 %v2829_v32  ;;  %2131 = vmatprep.mubr.msk.f32.mxu0 %vm2476_vm1, %v2475_v1 }
 0xb5a   : > { %2197 = vmatprep.subr.bf16.mxu0 %v2477_v16 }
 0xb79   : > { %v1365_v51 = vpop.permute.xlu0 %1364 }
 0xb7a   : > { %1367 = vxpose.xlu1.b32.start.end [1/1] (short) (narrow) %v1365_v51, 8 }
 0xb98   : > { %1450 = vrot.lane.b32.xlu1 %v1360_v44, %s2480_s16 }
 0xbfa   : > { %v1383_v53 = vpop.trf.xlu1 }
 0xbfb   : > { %v1402_v54 = vrot.slane %v1383_v53, %v2762_v50 }
 0xbfd   : > { %v1403_v55 = vmul.f32 %v2770_v52, %v1402_v54  ;;  %v2014_v54 = vld [vmem:[%s2946_s8 + $0x1] ss:$0 sm:$0xff] }
 0xbff   : > { %v1404_v56 = vsel %vm794_vm6, %v1403_v55, 0.0 }
 0xc00   : > { %1405 = vadd.xlane.f32.xlu0 %v1404_v56 }
 0xc0a   : > { %v1451_v57 = vpop.permute.xlu1 %1450 }
 0xc0b   : > { %1453 = vxpose.xlu1.b32.start.end [1/1] (short) (narrow) %v1451_v57, 8 }
 0xc2b   : > { %v1343_v58 = vpop.f32.mrb[8].mxu0 }
 0xc2c   : > { %v2128_v59 = vpop.f32.mrb[9].mxu0 }
 0xc8b   : > { %v1469_v7 = vpop.trf.xlu1 }
 0xc8c   : > { %v1488_v11 = vrot.slane %v1469_v7, %v2762_v50  ;;  %v1157_v7 = vstv %s1996_s28 }
 0xc8d   : > { %v1406_v60 = vpop.xlane.xlu0 %1405 }
 0xc8e   : > { %1407 = vxpose.xlu0.b32.start.end [1/1] (short) (narrow) %v1406_v60, 8 }
 0xd0e   : > { %v1423_v0 = vpop.trf.xlu0 }
 0xd0f   : > { %v1442_v2 = vrot.slane %v1423_v0, %v2762_v50  ;;  %v2204_v0 = vpack.c.bf16 %v1777_v63, %v1776_v62 }
 0xd11   : > { %v1443_v3 = vsub.f32 %v1406_v60, %v1442_v2 }
 0xd13   : > { %v1444_v4 = vsel %vm543_vm5, %v1443_v3, 0.0  ;;  %v1778_v3 = vld [vmem:[%s2947_s9 + $0x10] sm:$0xff] }
 0xd14   : > { %v1445_v6 = vmul.f32 1.442695, %v1444_v4  ;;  %v1779_v4 = vld [vmem:[%s2947_s9 + $0x18] sm:$0xff] }
 0xd16   : > { %2309 = vpow2.f32 %v1445_v6  ;;  %v2207_v6 = vpack.c.bf16 %v1779_v4, %v1778_v3 }
 0xd20   : > { %v2310_v8 = vpop.eup %2309 }
 0xd21   : > { %v1447_v10 = vmul.f32 %v2310_v8, %v2770_v52 }
 0xd23   : > { %v1448_v12 = vmul.f32 %v1447_v10, %v1343_v58  ;;  %v1158_v10 = vmul.f32 %v1157_v7, %v2800_v9 }
 0xd25   : > { %v1489_v13 = vmul.f32 %v1488_v11, %v1448_v12 }
 0xd27   : > { %2132 = vmatmul.mubr.msk.f32.vlgmr.msra.gmra.mrb[10].mxu0 %vm794_vm6, %v1489_v13 }
 0xd28   : > { %2153 = vmatprep.mubr.msk.f32.mxu0 %vm2476_vm1, %v2475_v1  ;;  %2199 = vmatpush3.bf16.msra.mxu0 %v2198_v20 }
 0xd29   : > { %2200 = vmatprep.subr.bf16.mxu0 %v2477_v16 }
 0xd2c   : > { %2202 = vmatpush3.bf16.msra.mxu0 %v2201_v23 }
 0xdfa   : > { %v1561_v52 = vpop.f32.mrb[10].mxu0 }
 0xdfb   : > { %v1562_v5 = vadd.f32 %v1561_v52, %v1491_v49  ;;  %v2133_v50 = vpop.f32.mrb[11].mxu0 }
 0xdfd   : > { %2143 = vmatmul.mubr.msk.f32.vlgmr.msra.gmra.mrb[6].mxu1 %vm551_vm3, %v1562_v5  ;;  %v1780_v5 = vld [vmem:[%s2948_s10] sm:$0x1] }
 0xdfe   : > { %2164 = vmatprep.mubr.msk.f32.mxu1 %vm2476_vm1, %v2475_v1  ;;  %2205 = vmatpush3.bf16.msra.mxu1 %v2204_v0 }
 0xdff   : > { %2206 = vmatprep.subr.bf16.mxu1 %v2477_v16 }
 0xe02   : > { %2208 = vmatpush3.bf16.msra.mxu1 %v2207_v6 }
 0xed0   : > { %v1639_v24 = vpop.f32.mrb[6].mxu1 }
 0xed1   : > { %v1643_v25 = vmul.f32 0.70710677, %v1639_v24  ;;  %v2144_v26 = vpop.f32.mrb[7].mxu1  ;;  %v1667_v47 = vmul.f32 0.5, %v1639_v24 }
 0xed3   : > { %v1644_v27 = vand.u32 2147483647, %v1643_v25  ;;  %vm1664_vm8 = vcmp.ge.f32.partialorder %v1643_v25, 0.0 }
 0xed5   : > { %v1645_v28 = vmul.f32 0.3275911, %v1644_v27  ;;  %v1658_v30 = vsub.f32 0.0, %v1644_v27 }
 0xed7   : > { %v1646_v29 = vadd.f32 1.0, %v1645_v28  ;;  %v1659_v1 = vmul.f32 %v1658_v30, %v1644_v27 }
 0xed9   : > { %2311 = vrcp.f32 %v1646_v29  ;;  %v1660_v34 = vmul.f32 1.442695, %v1659_v1 }
 0xedb   : > { %2313 = vpow2.f32 %v1660_v34 }
 0xee3   : > { %v2312_v31 = vpop.eup %2311 }
 0xee4   : > { %v1649_v32 = vmul.f32 1.0614054, %v2312_v31 }
 0xee5   : > { %v2314_v42 = vpop.eup %2313 }
 0xee6   : > { %v1650_v33 = vadd.f32 -1.4531521, %v1649_v32 }
 0xee8   : > { %v1651_v35 = vmul.f32 %v2312_v31, %v1650_v33 }
 0xeea   : > { %v1652_v36 = vadd.f32 1.4214138, %v1651_v35 }
 0xeec   : > { %v1653_v37 = vmul.f32 %v2312_v31, %v1652_v36 }
 0xeee   : > { %v1654_v38 = vadd.f32 -0.28449672, %v1653_v37 }
 0xef0   : > { %v1655_v39 = vmul.f32 %v2312_v31, %v1654_v38 }
 0xef2   : > { %v1656_v40 = vadd.f32 0.2548296, %v1655_v39 }
 0xef4   : > { %v1657_v41 = vmul.f32 %v2312_v31, %v1656_v40 }
 0xef6   : > { %v1662_v43 = vmul.f32 %v2314_v42, %v1657_v41 }
 0xef8   : > { %v1663_v44 = vsub.f32 1.0, %v1662_v43 }
 0xefa   : > { %v1665_v45 = vsub.f32 0.0, %v1663_v44 }
 0xefc   : > { %v1666_v46 = vsel %vm1664_vm8, %v1663_v44, %v1665_v45 }
 0xefd   : > { %v1668_v51 = vadd.f32 1.0, %v1666_v46 }
 0xeff   : > { %v1669_v53 = vmul.f32 %v1668_v51, %v1667_v47 }
 0xf01   : > { %2154 = vmatmul.mubr.msk.f32.vlgmr.msra.gmra.mrb[12].mxu0 %vm551_vm3, %v1669_v53 }
 0xfd4   : > { %v1752_v55 = vpop.f32.mrb[12].mxu0 }
 0xfd5   : > { %v1753_v56 = vadd.f32 %v2014_v54, %v1752_v55  ;;  %v2155_v57 = vpop.f32.mrb[13].mxu0 }
 0xfd7   : > { %v1756_v58 = vsub.f32 0.0, %v1753_v56 }
 0xfd9   : > { %v1757_v59 = vmul.f32 1.442695, %v1756_v58 }
 0xfdb   : > { %2315 = vpow2.f32 %v1757_v59 }
 0xfe5   : > { %v2316_v60 = vpop.eup %2315 }
 0xfe6   : > { %v1759_v61 = vadd.f32 1.0, %v2316_v60 }
 0xfe8   : > { %2317 = vrcp.f32 %v1759_v61 }
 0xff2   : > { %v2318_v2 = vpop.eup %2317 }
 0xff3   : > { %1763 = vrot.lane.b32.xlu0 %v2318_v2, %s2478_s30 }
0x1065   : > { %v1764_v8 = vpop.permute.xlu0 %1763 }
0x1066   : > { %v1766_v11 = vmul.f32 %v1764_v8, %v1753_v56 }
0x1068   : > { %v1767_v12 = vadd.f32 %v1766_v11, %v1158_v10 }
0x106a   : > { %v1768_v13 = vsel %vm551_vm3, %v1767_v12, 0.0 }
0x106b   : > { %v1769_v16 = vrot.slane %v1768_v13, 4 }
0x106d   : > { %v1770_v14 = vadd.f32 %v1769_v16, %v1768_v13 }
0x106f   : > { %v1771_v15 = vrot.slane %v1770_v14, 2 }
0x1071   : > { %v1772_v17 = vadd.f32 %v1771_v15, %v1770_v14 }
0x1073   : > { %v1773_v48 = vrot.slane %v1772_v17, 1 }
0x1075   : > { %v1774_v49 = vadd.f32 %v1773_v48, %v1772_v17 }
0x1077   : > { %v1775_v52 = vmul.f32 0.125, %v1774_v49 }
0x1079   : > { %2165 = vmatmul.mubr.msk.f32.vlgmr.msra.gmra.mrb[8].mxu1 %vm551_vm3, %v1775_v52 }
0x114c   : > { %v1850_v50 = vpop.f32.mrb[8].mxu1 }
0x114d   : > { %v1851_v9 = vadd.f32 %v1850_v50, %v1780_v5  ;;  %v2166_v18 = vpop.f32.mrb[9].mxu1 }
0x114f   : > { %v1855_v19 = vsel %vm1854_vm9, %v1851_v9, -inf }
0x1150   : > { %1856 = vmax.xlane.f32.xlu1 %v1855_v19 }
0x11dd   : > { %v1857_v20 = vpop.xlane.xlu1 %1856 }
0x11de   : > { %v1858_v21 = vsub.f32 %v1851_v9, %v1857_v20 }
0x11e0   : > { %v1859_v22 = vmul.f32 1.442695, %v1858_v21 }
0x11e2   : > { %2319 = vpow2.f32 %v1859_v22 }
0x11ec   : > { %v2320_v23 = vpop.eup %2319 }
0x11ed   : > { %v1861_v24 = vsel %vm1854_vm9, %v2320_v23, 0.0 }
0x11ee   : > { %1862 = vadd.xlane.f32.xlu0 %v1861_v24 }
0x127b   : > { %v1863_v25 = vpop.xlane.xlu0 %1862 }
0x127c   : > { %2321 = vrcp.f32 %v1863_v25 }
0x1286   : > { %v2322_v26 = vpop.eup %2321 }
0x1287   : > { %v1865_v27 = vmul.f32 %v2322_v26, %v2320_v23 }
0x1289   : > { %1866 = vst.msk [vmem:[%s447_s17] sm:$0x1] %vm1854_vm9, %v1865_v27 }
0x128a   : > { %2407 = shalt.err (!%p2404_p1)
}
0x128b   : > { %s2408_s20 = scalar_lea.hbm %s2895_s24, 16  ;;  %s2412_s30 = scalar_lea.hbm %s2979_s12, 32 }
0x128c   : > { %p2409_p0 = scmp.ne.s32.totalorder %s2895_s24, %s2408_s20  ;;  %p2413_p2 = scmp.lt.u32.totalorder %s2895_s24, %s2979_s12 }
0x128d   : > { %p2414_p12 = scmp.lt.u32.totalorder %s2412_s30, %s2408_s20  ;;  %p2416_p3 = scmp.lt.u32.totalorder %s2408_s20, %s2895_s24 }
0x128e   : > { %p2410_p6 = pnand %p2409_p0, %p2585_p5 }
0x128f   : > { %p2415_p10 = por %p2414_p12, %p2413_p2 }
0x1290   : > { %p2411_p9 = pneg %p2410_p6 }
0x1291   : > { %p2417_p4 = por %p2416_p3, %p2415_p10 }
0x1293   : > { %p2418_p7 = pnand %p2417_p4, %p2411_p9 }
0x1295   : > { %2421 = shalt.err (!%p2418_p7)
}
0x1296   : > { %2221 = dma.vmem_to_hbm [thread:$0]  (%p2585_p5), %s2897_s23, 16, %s2895_s24, %s1868_s14  }
0x1297 PF: > { %s2980_s27 = sld [smem:[#allocation16_spill]]  ;;  %s2981_s17 = sld [smem:[#allocation14_spill]] }
0x1298   : > { %s2982_s16 = sld [smem:[#allocation19_spill]] }
0x129d   : > { %p2243_p8 = scmp.ge.s32.totalorder %s2980_s27, 2  ;;  %s1892_s11 = sand.u32 1, %s2981_s17  }
0x129e   : > { %p2983_p11 = scmp.ne.s32.totalorder %s2982_s16, 0  ;;  %s1893_s21 = scalar_lea.sflag [#allocation4], %s1892_s11 }
0x12a0   : > { %p2234_p13 = pnand %p2243_p8, %p2983_p11 }
0x12a2   : > { %2451 = dma.done.wait (!%p2234_p13), %s1893_s21, 16  }
0x12a3   : > { %2453 = vsyncadd (!%p2234_p13), %s1893_s21, 4294967280  ;;  %s2984_s24 = sld [smem:[#allocation17_spill]]  ;;  %s2985_s25 = sld [smem:[#allocation15_spill]] }
0x12a4   : > { %s2986_s23 = sld [smem:[#allocation18_spill]]  ;;  %s2987_s21 = smov %s2460_s22 }
0x12a9   : > { %p25_p1 = scmp.ge.s32.totalorder %s2984_s24, 4   ;;  %s2988_s22 = smov %s2985_s25 }
0x12ab   :  { %27 = sbr.rel (!%p25_p1) target bundleno = 9 (0x9), region = 123 }
0x12b2   :  { %1897 = vsyncpa [#allocation3], 1 }
0x12b3   :  { %1899 = vsyncpa [#allocation3 + $0x1], 1 }
0x12b4   :  { %1900 = vsyncpa [#allocation7], 1 }
0x12b5   :  { %1901 = vsyncpa [#allocation4], 1 }
0x12b6   :  { %1903 = vsyncpa [#allocation4 + $0x1], 1 }
0x12b7   :  { %1904 = vsyncpa [#allocation5], 1 }
0x12b8   :  { %1906 = vsyncpa [#allocation5 + $0x1], 1 }

</bundles_post_ra>
